<compile_context>
chip_gen: v5e
topology: v5e:2x2
jax: 0.10.0
libtpu: 0.0.40
codegen_flags: <defaults>
</compile_context>

<pallas_src>
import functools

import jax
import jax.numpy as jnp
from jax import lax
from jax.experimental import pallas as pl
from jax.experimental.pallas import tpu as pltpu


# ----------------------------------------------------------------------------
# Pallas kernel: fused bidirectional GRU recurrence (only the serial part).
# ----------------------------------------------------------------------------
def _make_bigru_kernel(T, B, H):
    H2, H4, H6 = 2 * H, 4 * H, 6 * H

    def kernel(gx_ref, msk_ref, h0_ref, whh_ref, bhhn_ref,
               out_ref, hN_ref, out_f_s, out_b_s):
        whh = whh_ref[...]        # (2H, 6H) block-structured recurrent weights
        bhh_n = bhhn_ref[...]     # (1, 6H)  recurrent n-gate bias (zeros elsewhere)
        h = h0_ref[...]           # (B, 2H)  [h_fwd | h_bwd], carried in vregs

        # Fully unrolled; iteration i fuses forward time i and backward time T-1-i.
        for i in range(T):
            gx = gx_ref[i]        # (B, 6H) hoisted input projection, biases folded,
                                  # gate-interleaved & time-remapped in the wrapper
            gh = jnp.dot(h, whh, preferred_element_type=jnp.float32) + bhh_n
            r = jax.nn.sigmoid(gx[:, 0:H2] + gh[:, 0:H2])
            z = jax.nn.sigmoid(gx[:, H2:H4] + gh[:, H2:H4])
            n = jnp.tanh(gx[:, H4:H6] + r * gh[:, H4:H6])
            h_new = (1.0 - z) * n + z * h

            m = msk_ref[i]                    # (B, 2H) precomputed 0/1 float mask
            h = h + m * (h_new - h)           # padded steps keep previous state
            out = m * h_new                   # padded steps emit 0

            out_f_s[i] = out[:, :H]           # forward output at time i
            out_b_s[T - 1 - i] = out[:, H:]   # backward output at time T-1-i

        # Single bulk, vectorized output store (no per-step RMW on out_ref).
        out_ref[...] = out_f_s[...] + out_b_s[...]
        hN_ref[...] = h                       # (B, 2H) lane-dense final hidden

    return kernel


# ----------------------------------------------------------------------------
# Wrapper: embedding gather + hoisted input projection in XLA, recurrence in Pallas.
# ----------------------------------------------------------------------------
def encoder_rnn_forward(tokens, input_lengths, hidden, params):
    """Pallas-backed equivalent of Encoder_RNN.forward."""
    T, B = tokens.shape
    E = params["embedding"].shape[1]
    H = params["wih_f"].shape[1] // 3
    H2, H3, H4, H6 = 2 * H, 3 * H, 4 * H, 6 * H
    f32 = jnp.float32

    # Embedding gather stays in XLA (fused with the hoisted input projection).
    emb = params["embedding"][tokens].astype(f32)                  # (T, B, E)

    wih_f, whh_f = params["wih_f"], params["whh_f"]
    wih_b, whh_b = params["wih_b"], params["whh_b"]
    bih_f, bhh_f = params["bih_f"], params["bhh_f"]
    bih_b, bhh_b = params["bih_b"], params["bhh_b"]

    # Fold b_ih + (r,z portion of) b_hh into the hoisted input projection.
    bfold_f = bih_f + jnp.concatenate([bhh_f[:H2], jnp.zeros((H,), f32)])
    bfold_b = bih_b + jnp.concatenate([bhh_b[:H2], jnp.zeros((H,), f32)])

    # Hoisted input projection for both directions: one (T*B, E) @ (E, 6H) matmul.
    # TODO(synk): at realistic sizes use bf16 dot operands (f32 accum) and a
    # batch-tiled grid (parallel dimension_semantics) instead of one VMEM slab.
    w_in = jnp.concatenate([wih_f, wih_b], axis=1)                 # (E, 6H)
    b_in = jnp.concatenate([bfold_f, bfold_b])                     # (6H,)
    gx = (emb.reshape(T * B, E) @ w_in + b_in).reshape(T, B, H6)
    gx_f, gx_b = gx[..., :H3], gx[..., H3:]
    gx_b_rev = gx_b[::-1]  # backward direction consumes time in reverse

    # Gate-interleaved, time-remapped per-iteration projection:
    # columns = [r_f r_b | z_f z_b | n_f n_b]
    gx_step = jnp.concatenate(
        [gx_f[..., 0:H],   gx_b_rev[..., 0:H],
         gx_f[..., H:H2],  gx_b_rev[..., H:H2],
         gx_f[..., H2:H3], gx_b_rev[..., H2:H3]], axis=-1)         # (T, B, 6H)

    # Block-structured recurrent weight: (B, 2H) @ (2H, 6H) -> gate-interleaved (B, 6H).
    zH = jnp.zeros((H, H), f32)
    top = jnp.concatenate([whh_f[:, 0:H], zH, whh_f[:, H:H2], zH,
                           whh_f[:, H2:H3], zH], axis=1)           # (H, 6H)
    bot = jnp.concatenate([zH, whh_b[:, 0:H], zH, whh_b[:, H:H2],
                           zH, whh_b[:, H2:H3]], axis=1)           # (H, 6H)
    whh_cat = jnp.concatenate([top, bot], axis=0)                  # (2H, 6H)

    # Only the n-gate recurrent bias must stay inside the recurrence (r * (Wh + b_hn)).
    bhh_n = jnp.concatenate([jnp.zeros((H4,), f32),
                             bhh_f[H2:H3], bhh_b[H2:H3]]).reshape(1, H6)

    # Precomputed per-iteration packed-sequence masks for the [fwd|bwd] halves.
    t_idx = jnp.arange(T)
    m_f = (t_idx[:, None] < input_lengths[None, :].astype(jnp.int32)).astype(f32)  # (T, B)
    m_b = m_f[::-1]                                                # time T-1-i at iteration i
    msk = jnp.concatenate([jnp.repeat(m_f[..., None], H, axis=-1),
                           jnp.repeat(m_b[..., None], H, axis=-1)], axis=-1)       # (T, B, 2H)

    h0_cat = jnp.concatenate([hidden[0], hidden[1]], axis=-1).astype(f32)          # (B, 2H)

    kernel = _make_bigru_kernel(T, B, H)
    vmem = pl.BlockSpec(memory_space=pltpu.MemorySpace.VMEM)

    outputs, h_cat_n = pl.pallas_call(
        kernel,
        out_shape=(jax.ShapeDtypeStruct((T, B, H), f32),
                   jax.ShapeDtypeStruct((B, H2), f32)),
        in_specs=[vmem] * 5,
        out_specs=(vmem, vmem),
        scratch_shapes=[pltpu.VMEM((T, B, H), f32),
                        pltpu.VMEM((T, B, H), f32)],
    )(gx_step, msk, h0_cat, whh_cat, bhh_n)

    h_n = jnp.stack([h_cat_n[:, :H], h_cat_n[:, H:]], axis=0)      # (2, B, H)
    return outputs, h_n


# ----------------------------------------------------------------------------
# Pure-JAX reference (same packed-sequence masking semantics) for validation.
# ----------------------------------------------------------------------------
def encoder_rnn_reference(tokens, input_lengths, hidden, params):
    T, B = tokens.shape
    H = params["wih_f"].shape[1] // 3
    embedded = params["embedding"][tokens]

    def cell(x_t, h, wih, whh, bih, bhh):
        gx = x_t @ wih + bih
        gh = h @ whh + bhh
        r = jax.nn.sigmoid(gx[:, :H] + gh[:, :H])
        z = jax.nn.sigmoid(gx[:, H:2 * H] + gh[:, H:2 * H])
        n = jnp.tanh(gx[:, 2 * H:] + r * gh[:, 2 * H:])
        return (1.0 - z) * n + z * h

    lens = input_lengths[:, None]

    def fwd_step(h, xs):
        x_t, t = xs
        h_new = cell(x_t, h, params["wih_f"], params["whh_f"],
                     params["bih_f"], params["bhh_f"])
        mask = lens > t
        h_upd = jnp.where(mask, h_new, h)
        return h_upd, jnp.where(mask, h_upd, 0.0)

    hF, outF = lax.scan(fwd_step, hidden[0], (embedded, jnp.arange(T)))

    def bwd_step(h, xs):
        x_t, t = xs
        h_new = cell(x_t, h, params["wih_b"], params["whh_b"],
                     params["bih_b"], params["bhh_b"])
        mask = lens > t
        h_upd = jnp.where(mask, h_new, h)
        return h_upd, jnp.where(mask, h_upd, 0.0)

    hB, outB_rev = lax.scan(bwd_step, hidden[1],
                            (embedded[::-1], jnp.arange(T)[::-1]))
    outB = outB_rev[::-1]
    return outF + outB, jnp.stack([hF, hB])


# ----------------------------------------------------------------------------
def init_params(key, vocab, E, H):
    ks = jax.random.split(key, 11)
    k = 1.0 / jnp.sqrt(H)
    u = lambda kk, shape: jax.random.uniform(kk, shape, jnp.float32, -k, k)
    return {
        "embedding": jax.random.normal(ks[0], (vocab, E), jnp.float32),
        # stored pre-transposed: (E, 3H) / (H, 3H), gate order [r|z|n]
        "wih_f": u(ks[1], (E, 3 * H)), "whh_f": u(ks[2], (H, 3 * H)),
        "bih_f": u(ks[3], (3 * H,)),   "bhh_f": u(ks[4], (3 * H,)),
        "wih_b": u(ks[5], (E, 3 * H)), "whh_b": u(ks[6], (H, 3 * H)),
        "bih_b": u(ks[7], (3 * H,)),   "bhh_b": u(ks[8], (3 * H,)),
    }


if __name__ == "__main__":
    T, B, E, H, VOCAB = 8, 2, 16, 32, 20

    key = jax.random.PRNGKey(0)
    kp, kt = jax.random.split(key)
    params = init_params(kp, VOCAB, E, H)

    tokens = jax.random.randint(kt, (T, B), 0, VOCAB, dtype=jnp.int32)
    input_lengths = jnp.array([T, 5], dtype=jnp.int32)      # sorted decreasing
    hidden0 = jnp.zeros((2, B, H), jnp.float32)              # init_hidden()

    fwd = jax.jit(functools.partial(encoder_rnn_forward, params=params))
    outputs, h_n = fwd(tokens, input_lengths, hidden0)
    jax.block_until_ready((outputs, h_n))

    ref_out, ref_h = encoder_rnn_reference(tokens, input_lengths, hidden0, params)
    assert outputs.shape == (T, B, H) and h_n.shape == (2, B, H)
    assert jnp.allclose(outputs, ref_out, atol=1e-4, rtol=1e-4)
    assert jnp.allclose(h_n, ref_h, atol=1e-4, rtol=1e-4)

    print("KERNEL_OK")
</pallas_src>

<mosaic_0001>
module attributes {stable_mosaic.version = 11 : i64} {
  func.func @kernel(%arg0: memref<8x2x192xf32, #tpu.memory_space<vmem>>, %arg1: memref<8x2x64xf32, #tpu.memory_space<vmem>>, %arg2: memref<2x64xf32, #tpu.memory_space<vmem>>, %arg3: memref<64x192xf32, #tpu.memory_space<vmem>>, %arg4: memref<1x192xf32, #tpu.memory_space<vmem>>, %arg5: memref<8x2x32xf32, #tpu.memory_space<vmem>>, %arg6: memref<2x64xf32, #tpu.memory_space<vmem>>, %arg7: memref<8x2x32xf32, #tpu.memory_space<vmem>>, %arg8: memref<8x2x32xf32, #tpu.memory_space<vmem>>) attributes {dimension_semantics = [], scalar_prefetch = 0 : i64, scratch_operands = 2 : i64, tpu.core_type = #tpu.core_type<tc>} {
    %c0 = arith.constant 0 : index
    %c0_0 = arith.constant 0 : index
    %0 = vector.load %arg3[%c0, %c0_0] : memref<64x192xf32, #tpu.memory_space<vmem>>, vector<64x192xf32>
    %c0_1 = arith.constant 0 : index
    %c0_2 = arith.constant 0 : index
    %1 = vector.load %arg4[%c0_1, %c0_2] : memref<1x192xf32, #tpu.memory_space<vmem>>, vector<1x192xf32>
    %c0_3 = arith.constant 0 : index
    %c0_4 = arith.constant 0 : index
    %2 = vector.load %arg2[%c0_3, %c0_4] : memref<2x64xf32, #tpu.memory_space<vmem>>, vector<2x64xf32>
    %c0_5 = arith.constant 0 : index
    %c0_6 = arith.constant 0 : index
    %c0_7 = arith.constant 0 : index
    %3 = vector.load %arg0[%c0_5, %c0_6, %c0_7] : memref<8x2x192xf32, #tpu.memory_space<vmem>>, vector<1x2x192xf32>
    %4 = vector.shape_cast %3 : vector<1x2x192xf32> to vector<2x192xf32>
    %cst = arith.constant dense<0.000000e+00> : vector<2x192xf32>
    %5 = tpu.matmul %2, %0, %cst {dimension_numbers = #tpu.dot_dimension_numbers<[1], [0], [0], [1], [0, 0, 1, 1], [], []>} : vector<2x64xf32>, vector<64x192xf32>, vector<2x192xf32> -> vector<2x192xf32>
    %6 = vector.broadcast %1 : vector<1x192xf32> to vector<2x192xf32>
    %7 = arith.addf %5, %6 : vector<2x192xf32>
    %8 = vector.extract_strided_slice %4 {offsets = [0, 0], sizes = [2, 64], strides = [1, 1]} : vector<2x192xf32> to vector<2x64xf32>
    %9 = vector.extract_strided_slice %7 {offsets = [0, 0], sizes = [2, 64], strides = [1, 1]} : vector<2x192xf32> to vector<2x64xf32>
    %10 = arith.addf %8, %9 : vector<2x64xf32>
    %11 = arith.negf %10 : vector<2x64xf32>
    %12 = math.exp %11 : vector<2x64xf32>
    %cst_8 = arith.constant 1.000000e+00 : f32
    %13 = vector.broadcast %cst_8 : f32 to vector<2x64xf32>
    %14 = arith.addf %13, %12 : vector<2x64xf32>
    %15 = arith.divf %13, %14 : vector<2x64xf32>
    %16 = vector.extract_strided_slice %4 {offsets = [0, 64], sizes = [2, 64], strides = [1, 1]} : vector<2x192xf32> to vector<2x64xf32>
    %17 = vector.extract_strided_slice %7 {offsets = [0, 64], sizes = [2, 64], strides = [1, 1]} : vector<2x192xf32> to vector<2x64xf32>
    %18 = arith.addf %16, %17 : vector<2x64xf32>
    %19 = arith.negf %18 : vector<2x64xf32>
    %20 = math.exp %19 : vector<2x64xf32>
    %cst_9 = arith.constant 1.000000e+00 : f32
    %21 = vector.broadcast %cst_9 : f32 to vector<2x64xf32>
    %22 = arith.addf %21, %20 : vector<2x64xf32>
    %23 = arith.divf %21, %22 : vector<2x64xf32>
    %24 = vector.extract_strided_slice %4 {offsets = [0, 128], sizes = [2, 64], strides = [1, 1]} : vector<2x192xf32> to vector<2x64xf32>
    %25 = vector.extract_strided_slice %7 {offsets = [0, 128], sizes = [2, 64], strides = [1, 1]} : vector<2x192xf32> to vector<2x64xf32>
    %26 = arith.mulf %15, %25 : vector<2x64xf32>
    %27 = arith.addf %24, %26 : vector<2x64xf32>
    %28 = math.tanh %27 : vector<2x64xf32>
    %cst_10 = arith.constant 1.000000e+00 : f32
    %29 = vector.broadcast %cst_10 : f32 to vector<2x64xf32>
    %30 = arith.subf %29, %23 : vector<2x64xf32>
    %31 = arith.mulf %30, %28 : vector<2x64xf32>
    %32 = arith.mulf %23, %2 : vector<2x64xf32>
    %33 = arith.addf %31, %32 : vector<2x64xf32>
    %c0_11 = arith.constant 0 : index
    %c0_12 = arith.constant 0 : index
    %c0_13 = arith.constant 0 : index
    %34 = vector.load %arg1[%c0_11, %c0_12, %c0_13] : memref<8x2x64xf32, #tpu.memory_space<vmem>>, vector<1x2x64xf32>
    %35 = vector.shape_cast %34 : vector<1x2x64xf32> to vector<2x64xf32>
    %36 = arith.subf %33, %2 : vector<2x64xf32>
    %37 = arith.mulf %35, %36 : vector<2x64xf32>
    %38 = arith.addf %2, %37 : vector<2x64xf32>
    %39 = arith.mulf %35, %33 : vector<2x64xf32>
    %40 = vector.extract_strided_slice %39 {offsets = [0, 0], sizes = [2, 32], strides = [1, 1]} : vector<2x64xf32> to vector<2x32xf32>
    %c0_14 = arith.constant 0 : index
    %c0_15 = arith.constant 0 : index
    %c0_16 = arith.constant 0 : index
    %41 = vector.load %arg7[%c0_14, %c0_15, %c0_16] : memref<8x2x32xf32, #tpu.memory_space<vmem>>, vector<1x2x32xf32>
    %42 = vector.shape_cast %41 : vector<1x2x32xf32> to vector<2x32xf32>
    %43 = vector.shape_cast %40 : vector<2x32xf32> to vector<1x2x32xf32>
    tpu.vector_store %arg7[%c0_14, %c0_15, %c0_16], %43 {strides = array<i32>} : memref<8x2x32xf32, #tpu.memory_space<vmem>>, vector<1x2x32xf32>,
    %44 = vector.extract_strided_slice %39 {offsets = [0, 32], sizes = [2, 32], strides = [1, 1]} : vector<2x64xf32> to vector<2x32xf32>
    %c7 = arith.constant 7 : index
    %c0_17 = arith.constant 0 : index
    %c0_18 = arith.constant 0 : index
    %45 = vector.load %arg8[%c7, %c0_17, %c0_18] : memref<8x2x32xf32, #tpu.memory_space<vmem>>, vector<1x2x32xf32>
    %46 = vector.shape_cast %45 : vector<1x2x32xf32> to vector<2x32xf32>
    %47 = vector.shape_cast %44 : vector<2x32xf32> to vector<1x2x32xf32>
    tpu.vector_store %arg8[%c7, %c0_17, %c0_18], %47 {strides = array<i32>} : memref<8x2x32xf32, #tpu.memory_space<vmem>>, vector<1x2x32xf32>,
    %c1 = arith.constant 1 : index
    %c0_19 = arith.constant 0 : index
    %c0_20 = arith.constant 0 : index
    %48 = vector.load %arg0[%c1, %c0_19, %c0_20] : memref<8x2x192xf32, #tpu.memory_space<vmem>>, vector<1x2x192xf32>
    %49 = vector.shape_cast %48 : vector<1x2x192xf32> to vector<2x192xf32>
    %cst_21 = arith.constant dense<0.000000e+00> : vector<2x192xf32>
    %50 = tpu.matmul %38, %0, %cst_21 {dimension_numbers = #tpu.dot_dimension_numbers<[1], [0], [0], [1], [0, 0, 1, 1], [], []>} : vector<2x64xf32>, vector<64x192xf32>, vector<2x192xf32> -> vector<2x192xf32>
    %51 = vector.broadcast %1 : vector<1x192xf32> to vector<2x192xf32>
    %52 = arith.addf %50, %51 : vector<2x192xf32>
    %53 = vector.extract_strided_slice %49 {offsets = [0, 0], sizes = [2, 64], strides = [1, 1]} : vector<2x192xf32> to vector<2x64xf32>
    %54 = vector.extract_strided_slice %52 {offsets = [0, 0], sizes = [2, 64], strides = [1, 1]} : vector<2x192xf32> to vector<2x64xf32>
    %55 = arith.addf %53, %54 : vector<2x64xf32>
    %56 = arith.negf %55 : vector<2x64xf32>
    %57 = math.exp %56 : vector<2x64xf32>
    %cst_22 = arith.constant 1.000000e+00 : f32
    %58 = vector.broadcast %cst_22 : f32 to vector<2x64xf32>
    %59 = arith.addf %58, %57 : vector<2x64xf32>
    %60 = arith.divf %58, %59 : vector<2x64xf32>
    %61 = vector.extract_strided_slice %49 {offsets = [0, 64], sizes = [2, 64], strides = [1, 1]} : vector<2x192xf32> to vector<2x64xf32>
    %62 = vector.extract_strided_slice %52 {offsets = [0, 64], sizes = [2, 64], strides = [1, 1]} : vector<2x192xf32> to vector<2x64xf32>
    %63 = arith.addf %61, %62 : vector<2x64xf32>
    %64 = arith.negf %63 : vector<2x64xf32>
    %65 = math.exp %64 : vector<2x64xf32>
    %cst_23 = arith.constant 1.000000e+00 : f32
    %66 = vector.broadcast %cst_23 : f32 to vector<2x64xf32>
    %67 = arith.addf %66, %65 : vector<2x64xf32>
    %68 = arith.divf %66, %67 : vector<2x64xf32>
    %69 = vector.extract_strided_slice %49 {offsets = [0, 128], sizes = [2, 64], strides = [1, 1]} : vector<2x192xf32> to vector<2x64xf32>
    %70 = vector.extract_strided_slice %52 {offsets = [0, 128], sizes = [2, 64], strides = [1, 1]} : vector<2x192xf32> to vector<2x64xf32>
    %71 = arith.mulf %60, %70 : vector<2x64xf32>
    %72 = arith.addf %69, %71 : vector<2x64xf32>
    %73 = math.tanh %72 : vector<2x64xf32>
    %cst_24 = arith.constant 1.000000e+00 : f32
    %74 = vector.broadcast %cst_24 : f32 to vector<2x64xf32>
    %75 = arith.subf %74, %68 : vector<2x64xf32>
    %76 = arith.mulf %75, %73 : vector<2x64xf32>
    %77 = arith.mulf %68, %38 : vector<2x64xf32>
    %78 = arith.addf %76, %77 : vector<2x64xf32>
    %c1_25 = arith.constant 1 : index
    %c0_26 = arith.constant 0 : index
    %c0_27 = arith.constant 0 : index
    %79 = vector.load %arg1[%c1_25, %c0_26, %c0_27] : memref<8x2x64xf32, #tpu.memory_space<vmem>>, vector<1x2x64xf32>
    %80 = vector.shape_cast %79 : vector<1x2x64xf32> to vector<2x64xf32>
    %81 = arith.subf %78, %38 : vector<2x64xf32>
    %82 = arith.mulf %80, %81 : vector<2x64xf32>
    %83 = arith.addf %38, %82 : vector<2x64xf32>
    %84 = arith.mulf %80, %78 : vector<2x64xf32>
    %85 = vector.extract_strided_slice %84 {offsets = [0, 0], sizes = [2, 32], strides = [1, 1]} : vector<2x64xf32> to vector<2x32xf32>
    %c1_28 = arith.constant 1 : index
    %c0_29 = arith.constant 0 : index
    %c0_30 = arith.constant 0 : index
    %86 = vector.load %arg7[%c1_28, %c0_29, %c0_30] : memref<8x2x32xf32, #tpu.memory_space<vmem>>, vector<1x2x32xf32>
    %87 = vector.shape_cast %86 : vector<1x2x32xf32> to vector<2x32xf32>
    %88 = vector.shape_cast %85 : vector<2x32xf32> to vector<1x2x32xf32>
    tpu.vector_store %arg7[%c1_28, %c0_29, %c0_30], %88 {strides = array<i32>} : memref<8x2x32xf32, #tpu.memory_space<vmem>>, vector<1x2x32xf32>,
    %89 = vector.extract_strided_slice %84 {offsets = [0, 32], sizes = [2, 32], strides = [1, 1]} : vector<2x64xf32> to vector<2x32xf32>
    %c6 = arith.constant 6 : index
    %c0_31 = arith.constant 0 : index
    %c0_32 = arith.constant 0 : index
    %90 = vector.load %arg8[%c6, %c0_31, %c0_32] : memref<8x2x32xf32, #tpu.memory_space<vmem>>, vector<1x2x32xf32>
    %91 = vector.shape_cast %90 : vector<1x2x32xf32> to vector<2x32xf32>
    %92 = vector.shape_cast %89 : vector<2x32xf32> to vector<1x2x32xf32>
    tpu.vector_store %arg8[%c6, %c0_31, %c0_32], %92 {strides = array<i32>} : memref<8x2x32xf32, #tpu.memory_space<vmem>>, vector<1x2x32xf32>,
    %c2 = arith.constant 2 : index
    %c0_33 = arith.constant 0 : index
    %c0_34 = arith.constant 0 : index
    %93 = vector.load %arg0[%c2, %c0_33, %c0_34] : memref<8x2x192xf32, #tpu.memory_space<vmem>>, vector<1x2x192xf32>
    %94 = vector.shape_cast %93 : vector<1x2x192xf32> to vector<2x192xf32>
    %cst_35 = arith.constant dense<0.000000e+00> : vector<2x192xf32>
    %95 = tpu.matmul %83, %0, %cst_35 {dimension_numbers = #tpu.dot_dimension_numbers<[1], [0], [0], [1], [0, 0, 1, 1], [], []>} : vector<2x64xf32>, vector<64x192xf32>, vector<2x192xf32> -> vector<2x192xf32>
    %96 = vector.broadcast %1 : vector<1x192xf32> to vector<2x192xf32>
    %97 = arith.addf %95, %96 : vector<2x192xf32>
    %98 = vector.extract_strided_slice %94 {offsets = [0, 0], sizes = [2, 64], strides = [1, 1]} : vector<2x192xf32> to vector<2x64xf32>
    %99 = vector.extract_strided_slice %97 {offsets = [0, 0], sizes = [2, 64], strides = [1, 1]} : vector<2x192xf32> to vector<2x64xf32>
    %100 = arith.addf %98, %99 : vector<2x64xf32>
    %101 = arith.negf %100 : vector<2x64xf32>
    %102 = math.exp %101 : vector<2x64xf32>
    %cst_36 = arith.constant 1.000000e+00 : f32
    %103 = vector.broadcast %cst_36 : f32 to vector<2x64xf32>
    %104 = arith.addf %103, %102 : vector<2x64xf32>
    %105 = arith.divf %103, %104 : vector<2x64xf32>
    %106 = vector.extract_strided_slice %94 {offsets = [0, 64], sizes = [2, 64], strides = [1, 1]} : vector<2x192xf32> to vector<2x64xf32>
    %107 = vector.extract_strided_slice %97 {offsets = [0, 64], sizes = [2, 64], strides = [1, 1]} : vector<2x192xf32> to vector<2x64xf32>
    %108 = arith.addf %106, %107 : vector<2x64xf32>
    %109 = arith.negf %108 : vector<2x64xf32>
    %110 = math.exp %109 : vector<2x64xf32>
    %cst_37 = arith.constant 1.000000e+00 : f32
    %111 = vector.broadcast %cst_37 : f32 to vector<2x64xf32>
    %112 = arith.addf %111, %110 : vector<2x64xf32>
    %113 = arith.divf %111, %112 : vector<2x64xf32>
    %114 = vector.extract_strided_slice %94 {offsets = [0, 128], sizes = [2, 64], strides = [1, 1]} : vector<2x192xf32> to vector<2x64xf32>
    %115 = vector.extract_strided_slice %97 {offsets = [0, 128], sizes = [2, 64], strides = [1, 1]} : vector<2x192xf32> to vector<2x64xf32>
    %116 = arith.mulf %105, %115 : vector<2x64xf32>
    %117 = arith.addf %114, %116 : vector<2x64xf32>
    %118 = math.tanh %117 : vector<2x64xf32>
    %cst_38 = arith.constant 1.000000e+00 : f32
    %119 = vector.broadcast %cst_38 : f32 to vector<2x64xf32>
    %120 = arith.subf %119, %113 : vector<2x64xf32>
    %121 = arith.mulf %120, %118 : vector<2x64xf32>
    %122 = arith.mulf %113, %83 : vector<2x64xf32>
    %123 = arith.addf %121, %122 : vector<2x64xf32>
    %c2_39 = arith.constant 2 : index
    %c0_40 = arith.constant 0 : index
    %c0_41 = arith.constant 0 : index
    %124 = vector.load %arg1[%c2_39, %c0_40, %c0_41] : memref<8x2x64xf32, #tpu.memory_space<vmem>>, vector<1x2x64xf32>
    %125 = vector.shape_cast %124 : vector<1x2x64xf32> to vector<2x64xf32>
    %126 = arith.subf %123, %83 : vector<2x64xf32>
    %127 = arith.mulf %125, %126 : vector<2x64xf32>
    %128 = arith.addf %83, %127 : vector<2x64xf32>
    %129 = arith.mulf %125, %123 : vector<2x64xf32>
    %130 = vector.extract_strided_slice %129 {offsets = [0, 0], sizes = [2, 32], strides = [1, 1]} : vector<2x64xf32> to vector<2x32xf32>
    %c2_42 = arith.constant 2 : index
    %c0_43 = arith.constant 0 : index
    %c0_44 = arith.constant 0 : index
    %131 = vector.load %arg7[%c2_42, %c0_43, %c0_44] : memref<8x2x32xf32, #tpu.memory_space<vmem>>, vector<1x2x32xf32>
    %132 = vector.shape_cast %131 : vector<1x2x32xf32> to vector<2x32xf32>
    %133 = vector.shape_cast %130 : vector<2x32xf32> to vector<1x2x32xf32>
    tpu.vector_store %arg7[%c2_42, %c0_43, %c0_44], %133 {strides = array<i32>} : memref<8x2x32xf32, #tpu.memory_space<vmem>>, vector<1x2x32xf32>,
    %134 = vector.extract_strided_slice %129 {offsets = [0, 32], sizes = [2, 32], strides = [1, 1]} : vector<2x64xf32> to vector<2x32xf32>
    %c5 = arith.constant 5 : index
    %c0_45 = arith.constant 0 : index
    %c0_46 = arith.constant 0 : index
    %135 = vector.load %arg8[%c5, %c0_45, %c0_46] : memref<8x2x32xf32, #tpu.memory_space<vmem>>, vector<1x2x32xf32>
    %136 = vector.shape_cast %135 : vector<1x2x32xf32> to vector<2x32xf32>
    %137 = vector.shape_cast %134 : vector<2x32xf32> to vector<1x2x32xf32>
    tpu.vector_store %arg8[%c5, %c0_45, %c0_46], %137 {strides = array<i32>} : memref<8x2x32xf32, #tpu.memory_space<vmem>>, vector<1x2x32xf32>,
    %c3 = arith.constant 3 : index
    %c0_47 = arith.constant 0 : index
    %c0_48 = arith.constant 0 : index
    %138 = vector.load %arg0[%c3, %c0_47, %c0_48] : memref<8x2x192xf32, #tpu.memory_space<vmem>>, vector<1x2x192xf32>
    %139 = vector.shape_cast %138 : vector<1x2x192xf32> to vector<2x192xf32>
    %cst_49 = arith.constant dense<0.000000e+00> : vector<2x192xf32>
    %140 = tpu.matmul %128, %0, %cst_49 {dimension_numbers = #tpu.dot_dimension_numbers<[1], [0], [0], [1], [0, 0, 1, 1], [], []>} : vector<2x64xf32>, vector<64x192xf32>, vector<2x192xf32> -> vector<2x192xf32>
    %141 = vector.broadcast %1 : vector<1x192xf32> to vector<2x192xf32>
    %142 = arith.addf %140, %141 : vector<2x192xf32>
    %143 = vector.extract_strided_slice %139 {offsets = [0, 0], sizes = [2, 64], strides = [1, 1]} : vector<2x192xf32> to vector<2x64xf32>
    %144 = vector.extract_strided_slice %142 {offsets = [0, 0], sizes = [2, 64], strides = [1, 1]} : vector<2x192xf32> to vector<2x64xf32>
    %145 = arith.addf %143, %144 : vector<2x64xf32>
    %146 = arith.negf %145 : vector<2x64xf32>
    %147 = math.exp %146 : vector<2x64xf32>
    %cst_50 = arith.constant 1.000000e+00 : f32
    %148 = vector.broadcast %cst_50 : f32 to vector<2x64xf32>
    %149 = arith.addf %148, %147 : vector<2x64xf32>
    %150 = arith.divf %148, %149 : vector<2x64xf32>
    %151 = vector.extract_strided_slice %139 {offsets = [0, 64], sizes = [2, 64], strides = [1, 1]} : vector<2x192xf32> to vector<2x64xf32>
    %152 = vector.extract_strided_slice %142 {offsets = [0, 64], sizes = [2, 64], strides = [1, 1]} : vector<2x192xf32> to vector<2x64xf32>
    %153 = arith.addf %151, %152 : vector<2x64xf32>
    %154 = arith.negf %153 : vector<2x64xf32>
    %155 = math.exp %154 : vector<2x64xf32>
    %cst_51 = arith.constant 1.000000e+00 : f32
    %156 = vector.broadcast %cst_51 : f32 to vector<2x64xf32>
    %157 = arith.addf %156, %155 : vector<2x64xf32>
    %158 = arith.divf %156, %157 : vector<2x64xf32>
    %159 = vector.extract_strided_slice %139 {offsets = [0, 128], sizes = [2, 64], strides = [1, 1]} : vector<2x192xf32> to vector<2x64xf32>
    %160 = vector.extract_strided_slice %142 {offsets = [0, 128], sizes = [2, 64], strides = [1, 1]} : vector<2x192xf32> to vector<2x64xf32>
    %161 = arith.mulf %150, %160 : vector<2x64xf32>
    %162 = arith.addf %159, %161 : vector<2x64xf32>
    %163 = math.tanh %162 : vector<2x64xf32>
    %cst_52 = arith.constant 1.000000e+00 : f32
    %164 = vector.broadcast %cst_52 : f32 to vector<2x64xf32>
    %165 = arith.subf %164, %158 : vector<2x64xf32>
    %166 = arith.mulf %165, %163 : vector<2x64xf32>
    %167 = arith.mulf %158, %128 : vector<2x64xf32>
    %168 = arith.addf %166, %167 : vector<2x64xf32>
    %c3_53 = arith.constant 3 : index
    %c0_54 = arith.constant 0 : index
    %c0_55 = arith.constant 0 : index
    %169 = vector.load %arg1[%c3_53, %c0_54, %c0_55] : memref<8x2x64xf32, #tpu.memory_space<vmem>>, vector<1x2x64xf32>
    %170 = vector.shape_cast %169 : vector<1x2x64xf32> to vector<2x64xf32>
    %171 = arith.subf %168, %128 : vector<2x64xf32>
    %172 = arith.mulf %170, %171 : vector<2x64xf32>
    %173 = arith.addf %128, %172 : vector<2x64xf32>
    %174 = arith.mulf %170, %168 : vector<2x64xf32>
    %175 = vector.extract_strided_slice %174 {offsets = [0, 0], sizes = [2, 32], strides = [1, 1]} : vector<2x64xf32> to vector<2x32xf32>
    %c3_56 = arith.constant 3 : index
    %c0_57 = arith.constant 0 : index
    %c0_58 = arith.constant 0 : index
    %176 = vector.load %arg7[%c3_56, %c0_57, %c0_58] : memref<8x2x32xf32, #tpu.memory_space<vmem>>, vector<1x2x32xf32>
    %177 = vector.shape_cast %176 : vector<1x2x32xf32> to vector<2x32xf32>
    %178 = vector.shape_cast %175 : vector<2x32xf32> to vector<1x2x32xf32>
    tpu.vector_store %arg7[%c3_56, %c0_57, %c0_58], %178 {strides = array<i32>} : memref<8x2x32xf32, #tpu.memory_space<vmem>>, vector<1x2x32xf32>,
    %179 = vector.extract_strided_slice %174 {offsets = [0, 32], sizes = [2, 32], strides = [1, 1]} : vector<2x64xf32> to vector<2x32xf32>
    %c4 = arith.constant 4 : index
    %c0_59 = arith.constant 0 : index
    %c0_60 = arith.constant 0 : index
    %180 = vector.load %arg8[%c4, %c0_59, %c0_60] : memref<8x2x32xf32, #tpu.memory_space<vmem>>, vector<1x2x32xf32>
    %181 = vector.shape_cast %180 : vector<1x2x32xf32> to vector<2x32xf32>
    %182 = vector.shape_cast %179 : vector<2x32xf32> to vector<1x2x32xf32>
    tpu.vector_store %arg8[%c4, %c0_59, %c0_60], %182 {strides = array<i32>} : memref<8x2x32xf32, #tpu.memory_space<vmem>>, vector<1x2x32xf32>,
    %c4_61 = arith.constant 4 : index
    %c0_62 = arith.constant 0 : index
    %c0_63 = arith.constant 0 : index
    %183 = vector.load %arg0[%c4_61, %c0_62, %c0_63] : memref<8x2x192xf32, #tpu.memory_space<vmem>>, vector<1x2x192xf32>
    %184 = vector.shape_cast %183 : vector<1x2x192xf32> to vector<2x192xf32>
    %cst_64 = arith.constant dense<0.000000e+00> : vector<2x192xf32>
    %185 = tpu.matmul %173, %0, %cst_64 {dimension_numbers = #tpu.dot_dimension_numbers<[1], [0], [0], [1], [0, 0, 1, 1], [], []>} : vector<2x64xf32>, vector<64x192xf32>, vector<2x192xf32> -> vector<2x192xf32>
    %186 = vector.broadcast %1 : vector<1x192xf32> to vector<2x192xf32>
    %187 = arith.addf %185, %186 : vector<2x192xf32>
    %188 = vector.extract_strided_slice %184 {offsets = [0, 0], sizes = [2, 64], strides = [1, 1]} : vector<2x192xf32> to vector<2x64xf32>
    %189 = vector.extract_strided_slice %187 {offsets = [0, 0], sizes = [2, 64], strides = [1, 1]} : vector<2x192xf32> to vector<2x64xf32>
    %190 = arith.addf %188, %189 : vector<2x64xf32>
    %191 = arith.negf %190 : vector<2x64xf32>
    %192 = math.exp %191 : vector<2x64xf32>
    %cst_65 = arith.constant 1.000000e+00 : f32
    %193 = vector.broadcast %cst_65 : f32 to vector<2x64xf32>
    %194 = arith.addf %193, %192 : vector<2x64xf32>
    %195 = arith.divf %193, %194 : vector<2x64xf32>
    %196 = vector.extract_strided_slice %184 {offsets = [0, 64], sizes = [2, 64], strides = [1, 1]} : vector<2x192xf32> to vector<2x64xf32>
    %197 = vector.extract_strided_slice %187 {offsets = [0, 64], sizes = [2, 64], strides = [1, 1]} : vector<2x192xf32> to vector<2x64xf32>
    %198 = arith.addf %196, %197 : vector<2x64xf32>
    %199 = arith.negf %198 : vector<2x64xf32>
    %200 = math.exp %199 : vector<2x64xf32>
    %cst_66 = arith.constant 1.000000e+00 : f32
    %201 = vector.broadcast %cst_66 : f32 to vector<2x64xf32>
    %202 = arith.addf %201, %200 : vector<2x64xf32>
    %203 = arith.divf %201, %202 : vector<2x64xf32>
    %204 = vector.extract_strided_slice %184 {offsets = [0, 128], sizes = [2, 64], strides = [1, 1]} : vector<2x192xf32> to vector<2x64xf32>
    %205 = vector.extract_strided_slice %187 {offsets = [0, 128], sizes = [2, 64], strides = [1, 1]} : vector<2x192xf32> to vector<2x64xf32>
    %206 = arith.mulf %195, %205 : vector<2x64xf32>
    %207 = arith.addf %204, %206 : vector<2x64xf32>
    %208 = math.tanh %207 : vector<2x64xf32>
    %cst_67 = arith.constant 1.000000e+00 : f32
    %209 = vector.broadcast %cst_67 : f32 to vector<2x64xf32>
    %210 = arith.subf %209, %203 : vector<2x64xf32>
    %211 = arith.mulf %210, %208 : vector<2x64xf32>
    %212 = arith.mulf %203, %173 : vector<2x64xf32>
    %213 = arith.addf %211, %212 : vector<2x64xf32>
    %c4_68 = arith.constant 4 : index
    %c0_69 = arith.constant 0 : index
    %c0_70 = arith.constant 0 : index
    %214 = vector.load %arg1[%c4_68, %c0_69, %c0_70] : memref<8x2x64xf32, #tpu.memory_space<vmem>>, vector<1x2x64xf32>
    %215 = vector.shape_cast %214 : vector<1x2x64xf32> to vector<2x64xf32>
    %216 = arith.subf %213, %173 : vector<2x64xf32>
    %217 = arith.mulf %215, %216 : vector<2x64xf32>
    %218 = arith.addf %173, %217 : vector<2x64xf32>
    %219 = arith.mulf %215, %213 : vector<2x64xf32>
    %220 = vector.extract_strided_slice %219 {offsets = [0, 0], sizes = [2, 32], strides = [1, 1]} : vector<2x64xf32> to vector<2x32xf32>
    %c4_71 = arith.constant 4 : index
    %c0_72 = arith.constant 0 : index
    %c0_73 = arith.constant 0 : index
    %221 = vector.load %arg7[%c4_71, %c0_72, %c0_73] : memref<8x2x32xf32, #tpu.memory_space<vmem>>, vector<1x2x32xf32>
    %222 = vector.shape_cast %221 : vector<1x2x32xf32> to vector<2x32xf32>
    %223 = vector.shape_cast %220 : vector<2x32xf32> to vector<1x2x32xf32>
    tpu.vector_store %arg7[%c4_71, %c0_72, %c0_73], %223 {strides = array<i32>} : memref<8x2x32xf32, #tpu.memory_space<vmem>>, vector<1x2x32xf32>,
    %224 = vector.extract_strided_slice %219 {offsets = [0, 32], sizes = [2, 32], strides = [1, 1]} : vector<2x64xf32> to vector<2x32xf32>
    %c3_74 = arith.constant 3 : index
    %c0_75 = arith.constant 0 : index
    %c0_76 = arith.constant 0 : index
    %225 = vector.load %arg8[%c3_74, %c0_75, %c0_76] : memref<8x2x32xf32, #tpu.memory_space<vmem>>, vector<1x2x32xf32>
    %226 = vector.shape_cast %225 : vector<1x2x32xf32> to vector<2x32xf32>
    %227 = vector.shape_cast %224 : vector<2x32xf32> to vector<1x2x32xf32>
    tpu.vector_store %arg8[%c3_74, %c0_75, %c0_76], %227 {strides = array<i32>} : memref<8x2x32xf32, #tpu.memory_space<vmem>>, vector<1x2x32xf32>,
    %c5_77 = arith.constant 5 : index
    %c0_78 = arith.constant 0 : index
    %c0_79 = arith.constant 0 : index
    %228 = vector.load %arg0[%c5_77, %c0_78, %c0_79] : memref<8x2x192xf32, #tpu.memory_space<vmem>>, vector<1x2x192xf32>
    %229 = vector.shape_cast %228 : vector<1x2x192xf32> to vector<2x192xf32>
    %cst_80 = arith.constant dense<0.000000e+00> : vector<2x192xf32>
    %230 = tpu.matmul %218, %0, %cst_80 {dimension_numbers = #tpu.dot_dimension_numbers<[1], [0], [0], [1], [0, 0, 1, 1], [], []>} : vector<2x64xf32>, vector<64x192xf32>, vector<2x192xf32> -> vector<2x192xf32>
    %231 = vector.broadcast %1 : vector<1x192xf32> to vector<2x192xf32>
    %232 = arith.addf %230, %231 : vector<2x192xf32>
    %233 = vector.extract_strided_slice %229 {offsets = [0, 0], sizes = [2, 64], strides = [1, 1]} : vector<2x192xf32> to vector<2x64xf32>
    %234 = vector.extract_strided_slice %232 {offsets = [0, 0], sizes = [2, 64], strides = [1, 1]} : vector<2x192xf32> to vector<2x64xf32>
    %235 = arith.addf %233, %234 : vector<2x64xf32>
    %236 = arith.negf %235 : vector<2x64xf32>
    %237 = math.exp %236 : vector<2x64xf32>
    %cst_81 = arith.constant 1.000000e+00 : f32
    %238 = vector.broadcast %cst_81 : f32 to vector<2x64xf32>
    %239 = arith.addf %238, %237 : vector<2x64xf32>
    %240 = arith.divf %238, %239 : vector<2x64xf32>
    %241 = vector.extract_strided_slice %229 {offsets = [0, 64], sizes = [2, 64], strides = [1, 1]} : vector<2x192xf32> to vector<2x64xf32>
    %242 = vector.extract_strided_slice %232 {offsets = [0, 64], sizes = [2, 64], strides = [1, 1]} : vector<2x192xf32> to vector<2x64xf32>
    %243 = arith.addf %241, %242 : vector<2x64xf32>
    %244 = arith.negf %243 : vector<2x64xf32>
    %245 = math.exp %244 : vector<2x64xf32>
    %cst_82 = arith.constant 1.000000e+00 : f32
    %246 = vector.broadcast %cst_82 : f32 to vector<2x64xf32>
    %247 = arith.addf %246, %245 : vector<2x64xf32>
    %248 = arith.divf %246, %247 : vector<2x64xf32>
    %249 = vector.extract_strided_slice %229 {offsets = [0, 128], sizes = [2, 64], strides = [1, 1]} : vector<2x192xf32> to vector<2x64xf32>
    %250 = vector.extract_strided_slice %232 {offsets = [0, 128], sizes = [2, 64], strides = [1, 1]} : vector<2x192xf32> to vector<2x64xf32>
    %251 = arith.mulf %240, %250 : vector<2x64xf32>
    %252 = arith.addf %249, %251 : vector<2x64xf32>
    %253 = math.tanh %252 : vector<2x64xf32>
    %cst_83 = arith.constant 1.000000e+00 : f32
    %254 = vector.broadcast %cst_83 : f32 to vector<2x64xf32>
    %255 = arith.subf %254, %248 : vector<2x64xf32>
    %256 = arith.mulf %255, %253 : vector<2x64xf32>
    %257 = arith.mulf %248, %218 : vector<2x64xf32>
    %258 = arith.addf %256, %257 : vector<2x64xf32>
    %c5_84 = arith.constant 5 : index
    %c0_85 = arith.constant 0 : index
    %c0_86 = arith.constant 0 : index
    %259 = vector.load %arg1[%c5_84, %c0_85, %c0_86] : memref<8x2x64xf32, #tpu.memory_space<vmem>>, vector<1x2x64xf32>
    %260 = vector.shape_cast %259 : vector<1x2x64xf32> to vector<2x64xf32>
    %261 = arith.subf %258, %218 : vector<2x64xf32>
    %262 = arith.mulf %260, %261 : vector<2x64xf32>
    %263 = arith.addf %218, %262 : vector<2x64xf32>
    %264 = arith.mulf %260, %258 : vector<2x64xf32>
    %265 = vector.extract_strided_slice %264 {offsets = [0, 0], sizes = [2, 32], strides = [1, 1]} : vector<2x64xf32> to vector<2x32xf32>
    %c5_87 = arith.constant 5 : index
    %c0_88 = arith.constant 0 : index
    %c0_89 = arith.constant 0 : index
    %266 = vector.load %arg7[%c5_87, %c0_88, %c0_89] : memref<8x2x32xf32, #tpu.memory_space<vmem>>, vector<1x2x32xf32>
    %267 = vector.shape_cast %266 : vector<1x2x32xf32> to vector<2x32xf32>
    %268 = vector.shape_cast %265 : vector<2x32xf32> to vector<1x2x32xf32>
    tpu.vector_store %arg7[%c5_87, %c0_88, %c0_89], %268 {strides = array<i32>} : memref<8x2x32xf32, #tpu.memory_space<vmem>>, vector<1x2x32xf32>,
    %269 = vector.extract_strided_slice %264 {offsets = [0, 32], sizes = [2, 32], strides = [1, 1]} : vector<2x64xf32> to vector<2x32xf32>
    %c2_90 = arith.constant 2 : index
    %c0_91 = arith.constant 0 : index
    %c0_92 = arith.constant 0 : index
    %270 = vector.load %arg8[%c2_90, %c0_91, %c0_92] : memref<8x2x32xf32, #tpu.memory_space<vmem>>, vector<1x2x32xf32>
    %271 = vector.shape_cast %270 : vector<1x2x32xf32> to vector<2x32xf32>
    %272 = vector.shape_cast %269 : vector<2x32xf32> to vector<1x2x32xf32>
    tpu.vector_store %arg8[%c2_90, %c0_91, %c0_92], %272 {strides = array<i32>} : memref<8x2x32xf32, #tpu.memory_space<vmem>>, vector<1x2x32xf32>,
    %c6_93 = arith.constant 6 : index
    %c0_94 = arith.constant 0 : index
    %c0_95 = arith.constant 0 : index
    %273 = vector.load %arg0[%c6_93, %c0_94, %c0_95] : memref<8x2x192xf32, #tpu.memory_space<vmem>>, vector<1x2x192xf32>
    %274 = vector.shape_cast %273 : vector<1x2x192xf32> to vector<2x192xf32>
    %cst_96 = arith.constant dense<0.000000e+00> : vector<2x192xf32>
    %275 = tpu.matmul %263, %0, %cst_96 {dimension_numbers = #tpu.dot_dimension_numbers<[1], [0], [0], [1], [0, 0, 1, 1], [], []>} : vector<2x64xf32>, vector<64x192xf32>, vector<2x192xf32> -> vector<2x192xf32>
    %276 = vector.broadcast %1 : vector<1x192xf32> to vector<2x192xf32>
    %277 = arith.addf %275, %276 : vector<2x192xf32>
    %278 = vector.extract_strided_slice %274 {offsets = [0, 0], sizes = [2, 64], strides = [1, 1]} : vector<2x192xf32> to vector<2x64xf32>
    %279 = vector.extract_strided_slice %277 {offsets = [0, 0], sizes = [2, 64], strides = [1, 1]} : vector<2x192xf32> to vector<2x64xf32>
    %280 = arith.addf %278, %279 : vector<2x64xf32>
    %281 = arith.negf %280 : vector<2x64xf32>
    %282 = math.exp %281 : vector<2x64xf32>
    %cst_97 = arith.constant 1.000000e+00 : f32
    %283 = vector.broadcast %cst_97 : f32 to vector<2x64xf32>
    %284 = arith.addf %283, %282 : vector<2x64xf32>
    %285 = arith.divf %283, %284 : vector<2x64xf32>
    %286 = vector.extract_strided_slice %274 {offsets = [0, 64], sizes = [2, 64], strides = [1, 1]} : vector<2x192xf32> to vector<2x64xf32>
    %287 = vector.extract_strided_slice %277 {offsets = [0, 64], sizes = [2, 64], strides = [1, 1]} : vector<2x192xf32> to vector<2x64xf32>
    %288 = arith.addf %286, %287 : vector<2x64xf32>
    %289 = arith.negf %288 : vector<2x64xf32>
    %290 = math.exp %289 : vector<2x64xf32>
    %cst_98 = arith.constant 1.000000e+00 : f32
    %291 = vector.broadcast %cst_98 : f32 to vector<2x64xf32>
    %292 = arith.addf %291, %290 : vector<2x64xf32>
    %293 = arith.divf %291, %292 : vector<2x64xf32>
    %294 = vector.extract_strided_slice %274 {offsets = [0, 128], sizes = [2, 64], strides = [1, 1]} : vector<2x192xf32> to vector<2x64xf32>
    %295 = vector.extract_strided_slice %277 {offsets = [0, 128], sizes = [2, 64], strides = [1, 1]} : vector<2x192xf32> to vector<2x64xf32>
    %296 = arith.mulf %285, %295 : vector<2x64xf32>
    %297 = arith.addf %294, %296 : vector<2x64xf32>
    %298 = math.tanh %297 : vector<2x64xf32>
    %cst_99 = arith.constant 1.000000e+00 : f32
    %299 = vector.broadcast %cst_99 : f32 to vector<2x64xf32>
    %300 = arith.subf %299, %293 : vector<2x64xf32>
    %301 = arith.mulf %300, %298 : vector<2x64xf32>
    %302 = arith.mulf %293, %263 : vector<2x64xf32>
    %303 = arith.addf %301, %302 : vector<2x64xf32>
    %c6_100 = arith.constant 6 : index
    %c0_101 = arith.constant 0 : index
    %c0_102 = arith.constant 0 : index
    %304 = vector.load %arg1[%c6_100, %c0_101, %c0_102] : memref<8x2x64xf32, #tpu.memory_space<vmem>>, vector<1x2x64xf32>
    %305 = vector.shape_cast %304 : vector<1x2x64xf32> to vector<2x64xf32>
    %306 = arith.subf %303, %263 : vector<2x64xf32>
    %307 = arith.mulf %305, %306 : vector<2x64xf32>
    %308 = arith.addf %263, %307 : vector<2x64xf32>
    %309 = arith.mulf %305, %303 : vector<2x64xf32>
    %310 = vector.extract_strided_slice %309 {offsets = [0, 0], sizes = [2, 32], strides = [1, 1]} : vector<2x64xf32> to vector<2x32xf32>
    %c6_103 = arith.constant 6 : index
    %c0_104 = arith.constant 0 : index
    %c0_105 = arith.constant 0 : index
    %311 = vector.load %arg7[%c6_103, %c0_104, %c0_105] : memref<8x2x32xf32, #tpu.memory_space<vmem>>, vector<1x2x32xf32>
    %312 = vector.shape_cast %311 : vector<1x2x32xf32> to vector<2x32xf32>
    %313 = vector.shape_cast %310 : vector<2x32xf32> to vector<1x2x32xf32>
    tpu.vector_store %arg7[%c6_103, %c0_104, %c0_105], %313 {strides = array<i32>} : memref<8x2x32xf32, #tpu.memory_space<vmem>>, vector<1x2x32xf32>,
    %314 = vector.extract_strided_slice %309 {offsets = [0, 32], sizes = [2, 32], strides = [1, 1]} : vector<2x64xf32> to vector<2x32xf32>
    %c1_106 = arith.constant 1 : index
    %c0_107 = arith.constant 0 : index
    %c0_108 = arith.constant 0 : index
    %315 = vector.load %arg8[%c1_106, %c0_107, %c0_108] : memref<8x2x32xf32, #tpu.memory_space<vmem>>, vector<1x2x32xf32>
    %316 = vector.shape_cast %315 : vector<1x2x32xf32> to vector<2x32xf32>
    %317 = vector.shape_cast %314 : vector<2x32xf32> to vector<1x2x32xf32>
    tpu.vector_store %arg8[%c1_106, %c0_107, %c0_108], %317 {strides = array<i32>} : memref<8x2x32xf32, #tpu.memory_space<vmem>>, vector<1x2x32xf32>,
    %c7_109 = arith.constant 7 : index
    %c0_110 = arith.constant 0 : index
    %c0_111 = arith.constant 0 : index
    %318 = vector.load %arg0[%c7_109, %c0_110, %c0_111] : memref<8x2x192xf32, #tpu.memory_space<vmem>>, vector<1x2x192xf32>
    %319 = vector.shape_cast %318 : vector<1x2x192xf32> to vector<2x192xf32>
    %cst_112 = arith.constant dense<0.000000e+00> : vector<2x192xf32>
    %320 = tpu.matmul %308, %0, %cst_112 {dimension_numbers = #tpu.dot_dimension_numbers<[1], [0], [0], [1], [0, 0, 1, 1], [], []>} : vector<2x64xf32>, vector<64x192xf32>, vector<2x192xf32> -> vector<2x192xf32>
    %321 = vector.broadcast %1 : vector<1x192xf32> to vector<2x192xf32>
    %322 = arith.addf %320, %321 : vector<2x192xf32>
    %323 = vector.extract_strided_slice %319 {offsets = [0, 0], sizes = [2, 64], strides = [1, 1]} : vector<2x192xf32> to vector<2x64xf32>
    %324 = vector.extract_strided_slice %322 {offsets = [0, 0], sizes = [2, 64], strides = [1, 1]} : vector<2x192xf32> to vector<2x64xf32>
    %325 = arith.addf %323, %324 : vector<2x64xf32>
    %326 = arith.negf %325 : vector<2x64xf32>
    %327 = math.exp %326 : vector<2x64xf32>
    %cst_113 = arith.constant 1.000000e+00 : f32
    %328 = vector.broadcast %cst_113 : f32 to vector<2x64xf32>
    %329 = arith.addf %328, %327 : vector<2x64xf32>
    %330 = arith.divf %328, %329 : vector<2x64xf32>
    %331 = vector.extract_strided_slice %319 {offsets = [0, 64], sizes = [2, 64], strides = [1, 1]} : vector<2x192xf32> to vector<2x64xf32>
    %332 = vector.extract_strided_slice %322 {offsets = [0, 64], sizes = [2, 64], strides = [1, 1]} : vector<2x192xf32> to vector<2x64xf32>
    %333 = arith.addf %331, %332 : vector<2x64xf32>
    %334 = arith.negf %333 : vector<2x64xf32>
    %335 = math.exp %334 : vector<2x64xf32>
    %cst_114 = arith.constant 1.000000e+00 : f32
    %336 = vector.broadcast %cst_114 : f32 to vector<2x64xf32>
    %337 = arith.addf %336, %335 : vector<2x64xf32>
    %338 = arith.divf %336, %337 : vector<2x64xf32>
    %339 = vector.extract_strided_slice %319 {offsets = [0, 128], sizes = [2, 64], strides = [1, 1]} : vector<2x192xf32> to vector<2x64xf32>
    %340 = vector.extract_strided_slice %322 {offsets = [0, 128], sizes = [2, 64], strides = [1, 1]} : vector<2x192xf32> to vector<2x64xf32>
    %341 = arith.mulf %330, %340 : vector<2x64xf32>
    %342 = arith.addf %339, %341 : vector<2x64xf32>
    %343 = math.tanh %342 : vector<2x64xf32>
    %cst_115 = arith.constant 1.000000e+00 : f32
    %344 = vector.broadcast %cst_115 : f32 to vector<2x64xf32>
    %345 = arith.subf %344, %338 : vector<2x64xf32>
    %346 = arith.mulf %345, %343 : vector<2x64xf32>
    %347 = arith.mulf %338, %308 : vector<2x64xf32>
    %348 = arith.addf %346, %347 : vector<2x64xf32>
    %c7_116 = arith.constant 7 : index
    %c0_117 = arith.constant 0 : index
    %c0_118 = arith.constant 0 : index
    %349 = vector.load %arg1[%c7_116, %c0_117, %c0_118] : memref<8x2x64xf32, #tpu.memory_space<vmem>>, vector<1x2x64xf32>
    %350 = vector.shape_cast %349 : vector<1x2x64xf32> to vector<2x64xf32>
    %351 = arith.subf %348, %308 : vector<2x64xf32>
    %352 = arith.mulf %350, %351 : vector<2x64xf32>
    %353 = arith.addf %308, %352 : vector<2x64xf32>
    %354 = arith.mulf %350, %348 : vector<2x64xf32>
    %355 = vector.extract_strided_slice %354 {offsets = [0, 0], sizes = [2, 32], strides = [1, 1]} : vector<2x64xf32> to vector<2x32xf32>
    %c7_119 = arith.constant 7 : index
    %c0_120 = arith.constant 0 : index
    %c0_121 = arith.constant 0 : index
    %356 = vector.load %arg7[%c7_119, %c0_120, %c0_121] : memref<8x2x32xf32, #tpu.memory_space<vmem>>, vector<1x2x32xf32>
    %357 = vector.shape_cast %356 : vector<1x2x32xf32> to vector<2x32xf32>
    %358 = vector.shape_cast %355 : vector<2x32xf32> to vector<1x2x32xf32>
    tpu.vector_store %arg7[%c7_119, %c0_120, %c0_121], %358 {strides = array<i32>} : memref<8x2x32xf32, #tpu.memory_space<vmem>>, vector<1x2x32xf32>,
    %359 = vector.extract_strided_slice %354 {offsets = [0, 32], sizes = [2, 32], strides = [1, 1]} : vector<2x64xf32> to vector<2x32xf32>
    %c0_122 = arith.constant 0 : index
    %c0_123 = arith.constant 0 : index
    %c0_124 = arith.constant 0 : index
    %360 = vector.load %arg8[%c0_122, %c0_123, %c0_124] : memref<8x2x32xf32, #tpu.memory_space<vmem>>, vector<1x2x32xf32>
    %361 = vector.shape_cast %360 : vector<1x2x32xf32> to vector<2x32xf32>
    %362 = vector.shape_cast %359 : vector<2x32xf32> to vector<1x2x32xf32>
    tpu.vector_store %arg8[%c0_122, %c0_123, %c0_124], %362 {strides = array<i32>} : memref<8x2x32xf32, #tpu.memory_space<vmem>>, vector<1x2x32xf32>,
    %c0_125 = arith.constant 0 : index
    %c0_126 = arith.constant 0 : index
    %c0_127 = arith.constant 0 : index
    %363 = vector.load %arg7[%c0_125, %c0_126, %c0_127] : memref<8x2x32xf32, #tpu.memory_space<vmem>>, vector<8x2x32xf32>
    %c0_128 = arith.constant 0 : index
    %c0_129 = arith.constant 0 : index
    %c0_130 = arith.constant 0 : index
    %364 = vector.load %arg8[%c0_128, %c0_129, %c0_130] : memref<8x2x32xf32, #tpu.memory_space<vmem>>, vector<8x2x32xf32>
    %365 = arith.addf %363, %364 : vector<8x2x32xf32>
    %c0_131 = arith.constant 0 : index
    %c0_132 = arith.constant 0 : index
    %c0_133 = arith.constant 0 : index
    %366 = vector.load %arg5[%c0_131, %c0_132, %c0_133] : memref<8x2x32xf32, #tpu.memory_space<vmem>>, vector<8x2x32xf32>
    tpu.vector_store %arg5[%c0_131, %c0_132, %c0_133], %365 {strides = array<i32>} : memref<8x2x32xf32, #tpu.memory_space<vmem>>, vector<8x2x32xf32>,
    %c0_134 = arith.constant 0 : index
    %c0_135 = arith.constant 0 : index
    %367 = vector.load %arg6[%c0_134, %c0_135] : memref<2x64xf32, #tpu.memory_space<vmem>>, vector<2x64xf32>
    tpu.vector_store %arg6[%c0_134, %c0_135], %353 {strides = array<i32>} : memref<2x64xf32, #tpu.memory_space<vmem>>, vector<2x64xf32>,
    return
  }
}

</mosaic_0001>

<bundles_post_ra>
// kernel: reverse
= control target key start
LH: loop header
LB: loop body
LE: loop exit
PB: predicated region body
PF: predicated region fallthrough
CT: control target
= control target key end

     0   :  { %s104_s0 = inlined_call_operand.vmem [shape: f32[8,2,32], index: 0, kind: input, shape index: {}]   ;;  %s105_s1 = inlined_call_operand.vmem [shape: f32[8,2,32], index: 1, kind: output, shape index: {}]  }
   0x1   :  { %v32_v0 = vld [vmem:[%s104_s0 + $0xe] sm:$0x3]  ;;  %v33_v1 = vld [vmem:[%s104_s0 + $0xc] sm:$0x3]  ;;  %v35_v2 = vld [vmem:[%s104_s0 + $0xa] sm:$0x3] }
   0x2   :  { %4 = vst [vmem:[%s105_s1] sm:$0x3] %v32_v0  ;;  %v37_v3 = vld [vmem:[%s104_s0 + $0x8] sm:$0x3]  ;;  %v39_v4 = vld [vmem:[%s104_s0 + $0x6] sm:$0x3] }
   0x3   :  { %34 = vst [vmem:[%s105_s1 + $0x2] sm:$0x3] %v33_v1  ;;  %v41_v5 = vld [vmem:[%s104_s0 + $0x4] sm:$0x3]  ;;  %v43_v6 = vld [vmem:[%s104_s0 + $0x2] sm:$0x3] }
   0x4   :  { %36 = vst [vmem:[%s105_s1 + $0x4] sm:$0x3] %v35_v2  ;;  %v29_v7 = vld [vmem:[%s104_s0] sm:$0x3] }
   0x5   :  { %38 = vst [vmem:[%s105_s1 + $0x6] sm:$0x3] %v37_v3 }
   0x6   :  { %40 = vst [vmem:[%s105_s1 + $0x8] sm:$0x3] %v39_v4 }
   0x7   :  { %42 = vst [vmem:[%s105_s1 + $0xa] sm:$0x3] %v41_v5 }
   0x8   :  { %44 = vst [vmem:[%s105_s1 + $0xc] sm:$0x3] %v43_v6 }
   0x9   :  { %45 = vst [vmem:[%s105_s1 + $0xe] sm:$0x3] %v29_v7 }

// kernel: encoder_rnn_forward.1
= control target key start
LH: loop header
LB: loop body
LE: loop exit
PB: predicated region body
PF: predicated region fallthrough
CT: control target
= control target key end

     0   :  { %s1566_s0 = inlined_call_operand.vmem [shape: f32[8,2,192], index: 0, kind: input, shape index: {}]   ;;  %s1567_s1 = inlined_call_operand.vmem [shape: f32[8,2,64], index: 1, kind: input, shape index: {}]   ;;  %s1568_s2 = inlined_call_operand.vmem [shape: f32[2,64], index: 2, kind: input, shape index: {}]   ;;  %s1569_s3 = inlined_call_operand.vmem [shape: f32[64,192], index: 3, kind: input, shape index: {}]   ;;  %s1570_s4 = inlined_call_operand.vmem [shape: f32[1,192], index: 4, kind: input, shape index: {}]   ;;  %s1571_s5 = inlined_call_operand.hbm [shape: f32[8,2,32], index: 5, kind: output, shape index: {0}]   ;;  %s1572_s6 = inlined_call_operand.vmem [shape: f32[2,64], index: 6, kind: output, shape index: {1}]  }
   0x1   :  { %v1124_v0 = vld [vmem:[%s1569_s3 + $0x70] sm:$0xff]  ;;  %v1129_v1 = vld [vmem:[%s1569_s3 + $0x60] sm:$0xff]  ;;  %v1142_v3 = vld [vmem:[%s1569_s3 + $0x78] sm:$0xff] }
   0x2   :  { %59 = vmatpush.msra.mxu0 %v1124_v0  ;;  %166 = vmatpush.msra.mxu2 %v1124_v0  ;;  %v1136_v2 = vld [vmem:[%s1569_s3 + $0x50] sm:$0xff]  ;;  %v1147_v4 = vld [vmem:[%s1569_s3 + $0x68] sm:$0xff]  ;;  %v1153_v5 = vld [vmem:[%s1569_s3 + $0x40] sm:$0xff] }
   0x3   :  { %79 = vmatpush.msra.mxu1 %v1142_v3  ;;  %186 = vmatpush.msra.mxu3 %v1142_v3  ;;  %v1161_v6 = vld [vmem:[%s1569_s3 + $0x58] sm:$0xff]  ;;  %v1167_v7 = vld [vmem:[%s1569_s3 + $0x30] sm:$0xff] }
   0x4   :  { %60 = vmatpush.msra.mxu0 %v1129_v1  ;;  %167 = vmatpush.msra.mxu2 %v1129_v1 }
   0x5   :  { %80 = vmatpush.msra.mxu1 %v1147_v4  ;;  %187 = vmatpush.msra.mxu3 %v1147_v4 }
   0x6   :  { %61 = vmatpush.msra.mxu0 %v1136_v2  ;;  %168 = vmatpush.msra.mxu2 %v1136_v2 }
   0x7   :  { %12 = vsyncpa [#allocation5], 0  ;;  %v1175_v8 = vld [vmem:[%s1569_s3 + $0x48] sm:$0xff]  ;;  %v1181_v9 = vld [vmem:[%s1569_s3 + $0x20] sm:$0xff]  ;;  %81 = vmatpush.msra.mxu1 %v1161_v6  ;;  %188 = vmatpush.msra.mxu3 %v1161_v6  ;;  %vm47_vm0 = vcmask 523264   ;;  %s1082_s9 = smov 96  }
   0x8   :  { %62 = vmatpush.msra.mxu0 %v1153_v5  ;;  %169 = vmatpush.msra.mxu2 %v1153_v5  ;;  %v1189_v10 = vld [vmem:[%s1569_s3 + $0x38] sm:$0xff]  ;;  %v1195_v11 = vld [vmem:[%s1569_s3 + $0x10] sm:$0xff]  ;;  %v1203_v12 = vld [vmem:[%s1569_s3 + $0x28] sm:$0xff]  ;;  %s1083_s13 = smov [#allocation4]   ;;  %s948_s17 = sshll.u32 %s1571_s5, 4  ;;  %s949_s17 = int_to_ptr.hbm [resolvable:$true] %s948_s17 }
   0x9   :  { %82 = vmatpush.msra.mxu1 %v1175_v8  ;;  %189 = vmatpush.msra.mxu3 %v1175_v8  ;;  %v1209_v13 = vld [vmem:[%s1569_s3] sm:$0xff]  ;;  %v1222_v15 = vld [vmem:[%s1569_s3 + $0x18] sm:$0xff]  ;;  %v1231_v16 = vld [vmem:[%s1569_s3 + $0x8] sm:$0xff]  ;;  %s946_s14 = sshll.u32 %s1083_s13, 4  ;;  %s1084_s18 = smov 32   ;;  %s947_s14 = int_to_ptr.vmem [resolvable:$true] %s946_s14 }
   0xa   :  { %63 = vmatpush.msra.mxu0 %v1167_v7  ;;  %170 = vmatpush.msra.mxu2 %v1167_v7  ;;  %v1217_v14 = vld [vmem:[%s1568_s2] sm:$0x3]  ;;  %v967_v55 = vld [vmem:[%s1566_s0 + $0x4] sm:$0xf]  ;;  %s1085_s19 = smov 2  }
   0xb   :  { %83 = vmatpush.msra.mxu1 %v1189_v10  ;;  %190 = vmatpush.msra.mxu3 %v1189_v10  ;;  %v39_v17 = vld [vmem:[%s1570_s4] sm:$0x3]  ;;  %s1081_s4 = smov 64  }
   0xc   :  { %64 = vmatpush.msra.mxu0 %v1181_v9  ;;  %171 = vmatpush.msra.mxu2 %v1181_v9  ;;  %v1293_v18 = vperm.slane %v39_v17, 0  ;;  %v41_v19 = vld [vmem:[%s1566_s0] sm:$0xf]  ;;  %v1299_v28 = vperm.slane %v39_v17, 1 }
   0xd   :  { %84 = vmatpush.msra.mxu1 %v1203_v12  ;;  %191 = vmatpush.msra.mxu3 %v1203_v12  ;;  %v113_v37 = vrot.slane %v41_v19, 2  ;;  %v1309_v51 = vld [vmem:[%s1567_s1] sm:$0x3] }
   0xe   :  { %65 = vmatpush.msra.mxu0 %v1195_v11  ;;  %172 = vmatpush.msra.mxu2 %v1195_v11 }
   0xf   :  { %85 = vmatpush.msra.mxu1 %v1222_v15  ;;  %192 = vmatpush.msra.mxu3 %v1222_v15 }
  0x10   :  { %66 = vmatpush.msra.mxu0 %v1209_v13  ;;  %173 = vmatpush.msra.mxu2 %v1209_v13 }
  0x11   :  { %964 = vmatmul.msk.f32.vlgmr.msra.gmra.mxu0 %vm47_vm0, %v1217_v14  ;;  %86 = vmatpush.msra.mxu1 %v1231_v16 }
  0x12   :  { %274 = vmatpush.msrb.mxu0 %v1124_v0  ;;  %382 = vmatpush.msrb.mxu2 %v1124_v0 }
  0x13   :  { %965 = vmatmul.msk.f32.vlgmr.msra.gmra.mxu1 %vm47_vm0, %v1217_v14  ;;  %193 = vmatpush.msra.mxu3 %v1231_v16 }
  0x14   :  { %294 = vmatpush.msrb.mxu1 %v1142_v3  ;;  %275 = vmatpush.msrb.mxu0 %v1129_v1 }
  0x15   :  { %402 = vmatpush.msrb.mxu3 %v1142_v3  ;;  %383 = vmatpush.msrb.mxu2 %v1129_v1 }
  0x16   :  { %295 = vmatpush.msrb.mxu1 %v1147_v4  ;;  %276 = vmatpush.msrb.mxu0 %v1136_v2 }
  0x17   :  { %403 = vmatpush.msrb.mxu3 %v1147_v4  ;;  %384 = vmatpush.msrb.mxu2 %v1136_v2 }
  0x18   :  { %296 = vmatpush.msrb.mxu1 %v1161_v6  ;;  %277 = vmatpush.msrb.mxu0 %v1153_v5 }
  0x19   :  { %404 = vmatpush.msrb.mxu3 %v1161_v6  ;;  %385 = vmatpush.msrb.mxu2 %v1153_v5 }
  0x1a   :  { %297 = vmatpush.msrb.mxu1 %v1175_v8  ;;  %278 = vmatpush.msrb.mxu0 %v1167_v7 }
  0x1b   :  { %405 = vmatpush.msrb.mxu3 %v1175_v8  ;;  %386 = vmatpush.msrb.mxu2 %v1167_v7 }
  0x1c   :  { %298 = vmatpush.msrb.mxu1 %v1189_v10  ;;  %279 = vmatpush.msrb.mxu0 %v1181_v9 }
  0x1d   :  { %406 = vmatpush.msrb.mxu3 %v1189_v10  ;;  %387 = vmatpush.msrb.mxu2 %v1181_v9 }
  0x1e   :  { %299 = vmatpush.msrb.mxu1 %v1203_v12  ;;  %280 = vmatpush.msrb.mxu0 %v1195_v11 }
  0x1f   :  { %407 = vmatpush.msrb.mxu3 %v1203_v12  ;;  %388 = vmatpush.msrb.mxu2 %v1195_v11 }
  0x20   :  { %300 = vmatpush.msrb.mxu1 %v1222_v15  ;;  %281 = vmatpush.msrb.mxu0 %v1209_v13 }
  0x21   :  { %408 = vmatpush.msrb.mxu3 %v1222_v15  ;;  %389 = vmatpush.msrb.mxu2 %v1209_v13 }
  0x22   :  { %301 = vmatpush.msrb.mxu1 %v1231_v16  ;;  %490 = vmatpush.msra.mxu0 %v1124_v0 }
  0x23   :  { %409 = vmatpush.msrb.mxu3 %v1231_v16 }
  0x24   :  { %510 = vmatpush.msra.mxu1 %v1142_v3  ;;  %491 = vmatpush.msra.mxu0 %v1129_v1 }
  0x26   :  { %511 = vmatpush.msra.mxu1 %v1147_v4  ;;  %492 = vmatpush.msra.mxu0 %v1136_v2 }
  0x28   :  { %512 = vmatpush.msra.mxu1 %v1161_v6  ;;  %493 = vmatpush.msra.mxu0 %v1153_v5 }
  0x2a   :  { %513 = vmatpush.msra.mxu1 %v1175_v8  ;;  %494 = vmatpush.msra.mxu0 %v1167_v7 }
  0x2c   :  { %514 = vmatpush.msra.mxu1 %v1189_v10  ;;  %495 = vmatpush.msra.mxu0 %v1181_v9 }
  0x2e   :  { %515 = vmatpush.msra.mxu1 %v1203_v12  ;;  %496 = vmatpush.msra.mxu0 %v1195_v11 }
  0x30   :  { %516 = vmatpush.msra.mxu1 %v1222_v15  ;;  %497 = vmatpush.msra.mxu0 %v1209_v13 }
  0x32   :  { %517 = vmatpush.msra.mxu1 %v1231_v16 }
  0x8e   :  { %v68_v20 = vpop.f32.mrf.mxu0 }
  0x8f   :  { %v69_v21 = vadd.f32 %v68_v20, %v1293_v18 }
  0x90   :  { %v88_v30 = vpop.f32.mrf.mxu1 }
  0x91   :  { %v91_v22 = vadd.f32 %v69_v21, %v41_v19  ;;  %v89_v34 = vadd.f32 %v88_v30, %v1299_v28 }
  0x93   :  { %v966_v23 = vmul.f32 -1.442695, %v91_v22 }
  0x95   :  { %1007 = vpow2.f32 %v966_v23 }
  0x9b   :  { %v1008_v24 = vpop.eup %1007 }
  0x9c   :  { %v95_v25 = vadd.f32 1.0, %v1008_v24  ;;  %v220_v24 = vrot.slane %v967_v55, 2 }
  0x9e   :  { %1009 = vrcp.f32 %v95_v25  ;;  %v107_v31 = vand.u32 2147483648, %v95_v25  ;;  %v105_v33 = vand.u32 2147483647, %v95_v25  ;;  %vm101_vm2 = vweird.f32 %v95_v25 }
  0xa0   :  { %v108_v36 = vor.u32 1.1754944e-38, %v107_v31  ;;  %vm106_vm4 = vcmp.eq.f32.partialorder %v105_v33, 8.507059e+37 }
  0xa4   :  { %v1010_v26 = vpop.eup %1009 }
  0xa5   :  { %v97_v27 = vmul.f32 %v1010_v26, %v95_v25  ;;  %vm102_vm1 = vweird.f32 %v1010_v26 }
  0xa6   :  { %vm103_vm3 = vmor %vm101_vm2, %vm102_vm1 }
  0xa7   :  { %v98_v29 = vsub.f32 1.0, %v97_v27 }
  0xa9   :  { %v99_v32 = vmul.f32 %v1010_v26, %v98_v29 }
  0xab   :  { %v100_v35 = vadd.f32 %v1010_v26, %v99_v32 }
  0xad   :  { %v104_v38 = vsel %vm103_vm3, %v1010_v26, %v100_v35 }
  0xae   :  { %v109_v39 = vsel %vm106_vm4, %v108_v36, %v104_v38 }
  0xaf   :  { %v111_v40 = vmul.f32 %v109_v39, %v89_v34  ;;  %v117_v44 = vsub.f32 1.0, %v109_v39 }
  0xb1   :  { %v115_v41 = vadd.f32 %v113_v37, %v111_v40 }
  0xb3   :  { %1011 = vtanh.f32 %v115_v41  ;;  %v1349_v41 = vld [vmem:[%s1567_s1 + $0x2] sm:$0x3] }
  0xb9   :  { %v1012_v42 = vpop.eup %1011 }
  0xba   :  { %119 = vrot.lane.b32.xlu0 %v1012_v42, %s1081_s4 }
  0xc2   :  { %123 = vrot.lane.b32.xlu0 %v1217_v14, %s1081_s4 }
 0x12c   :  { %v120_v43 = vpop.permute.xlu0 %119 }
 0x12d   :  { %v122_v46 = vmul.f32 %v120_v43, %v117_v44 }
 0x134   :  { %v124_v45 = vpop.permute.xlu0 %123 }
 0x135   :  { %v126_v47 = vmul.f32 %v124_v45, %v109_v39 }
 0x137   :  { %v127_v48 = vadd.f32 %v126_v47, %v122_v46 }
 0x139   :  { %v129_v49 = vsub.f32 %v127_v48, %v124_v45  ;;  %v972_v45 = vld [vmem:[%s1566_s0 + $0x8] sm:$0xf] }
 0x13b   :  { %131 = vst [vmem:[#allocation1] ss:$4 sm:$0xff] %v129_v49 }
 0x142   :  { %v132_v50 = vld.sshfl [vmem:[#allocation1] sm:$0xff pattern:$0x73625140] }
 0x143   :  { %139 = vst [vmem:[#allocation1] ss:$4 sm:$0xff] %v127_v48  ;;  %133 = vrot.lane.b32.xlu1 %v132_v50, %s1081_s4 }
 0x14a   :  { %v1343_v39 = vld.sshfl [vmem:[#allocation1] sm:$0xff pattern:$0x73625140] }
 0x1b5   :  { %v134_v52 = vpop.permute.xlu1 %133 }
 0x1b6   :  { %v136_v53 = vmul.f32 %v134_v52, %v1309_v51 }
 0x1b8   :  { %v1313_v54 = vadd.f32 %v136_v53, %v1217_v14 }
 0x1ba   :  { %230 = vrot.lane.b32.xlu2 %v1313_v54, %s1081_s4  ;;  %968 = vmatmul.msk.f32.vlgmr.msra.gmra.mxu2 %vm47_vm0, %v1313_v54 }
 0x1bb   :  { %969 = vmatmul.msk.f32.vlgmr.msra.gmra.mxu3 %vm47_vm0, %v1313_v54  ;;  %598 = vmatpush.msra.mxu2 %v1124_v0 }
 0x1bc   :  { %618 = vmatpush.msra.mxu3 %v1142_v3 }
 0x1bd   :  { %599 = vmatpush.msra.mxu2 %v1129_v1 }
 0x1be   :  { %619 = vmatpush.msra.mxu3 %v1147_v4 }
 0x1bf   :  { %600 = vmatpush.msra.mxu2 %v1136_v2 }
 0x1c0   :  { %620 = vmatpush.msra.mxu3 %v1161_v6 }
 0x1c1   :  { %601 = vmatpush.msra.mxu2 %v1153_v5 }
 0x1c2   :  { %621 = vmatpush.msra.mxu3 %v1175_v8 }
 0x1c3   :  { %602 = vmatpush.msra.mxu2 %v1167_v7 }
 0x1c4   :  { %622 = vmatpush.msra.mxu3 %v1189_v10 }
 0x1c5   :  { %603 = vmatpush.msra.mxu2 %v1181_v9 }
 0x1c6   :  { %623 = vmatpush.msra.mxu3 %v1203_v12 }
 0x1c7   :  { %604 = vmatpush.msra.mxu2 %v1195_v11 }
 0x1c8   :  { %624 = vmatpush.msra.mxu3 %v1222_v15 }
 0x1c9   :  { %605 = vmatpush.msra.mxu2 %v1209_v13 }
 0x1ca   :  { %625 = vmatpush.msra.mxu3 %v1231_v16 }
 0x214   :  { %v231_v33 = vpop.permute.xlu2 %230 }
 0x23d   :  { %v175_v56 = vpop.f32.mrf.mxu2 }
 0x23e   :  { %v176_v57 = vadd.f32 %v175_v56, %v1293_v18  ;;  %v195_v21 = vpop.f32.mrf.mxu3 }
 0x23f   :  { %v196_v25 = vadd.f32 %v195_v21, %v1299_v28 }
 0x240   :  { %v198_v58 = vadd.f32 %v967_v55, %v176_v57 }
 0x242   :  { %v970_v59 = vmul.f32 -1.442695, %v198_v58 }
 0x244   :  { %1013 = vpow2.f32 %v970_v59 }
 0x24a   :  { %v1014_v60 = vpop.eup %1013 }
 0x24b   :  { %v202_v61 = vadd.f32 1.0, %v1014_v60 }
 0x24d   :  { %1015 = vrcp.f32 %v202_v61  ;;  %v214_v17 = vand.u32 2147483648, %v202_v61  ;;  %v212_v20 = vand.u32 2147483647, %v202_v61  ;;  %vm208_vm6 = vweird.f32 %v202_v61 }
 0x24f   :  { %v215_v23 = vor.u32 1.1754944e-38, %v214_v17  ;;  %vm213_vm8 = vcmp.eq.f32.partialorder %v212_v20, 8.507059e+37 }
 0x253   :  { %v1016_v62 = vpop.eup %1015 }
 0x254   :  { %v204_v63 = vmul.f32 %v1016_v62, %v202_v61  ;;  %vm209_vm5 = vweird.f32 %v1016_v62 }
 0x255   :  { %vm210_vm7 = vmor %vm208_vm6, %vm209_vm5 }
 0x256   :  { %v205_v14 = vsub.f32 1.0, %v204_v63 }
 0x258   :  { %v206_v19 = vmul.f32 %v1016_v62, %v205_v14 }
 0x25a   :  { %v207_v22 = vadd.f32 %v1016_v62, %v206_v19 }
 0x25c   :  { %v211_v26 = vsel %vm210_vm7, %v1016_v62, %v207_v22  ;;  %v328_v62 = vrot.slane %v972_v45, 2 }
 0x25d   :  { %v216_v27 = vsel %vm213_vm8, %v215_v23, %v211_v26 }
 0x25e   :  { %v218_v29 = vmul.f32 %v216_v27, %v196_v25  ;;  %v224_v32 = vsub.f32 1.0, %v216_v27  ;;  %v233_v35 = vmul.f32 %v231_v33, %v216_v27 }
 0x260   :  { %v222_v30 = vadd.f32 %v220_v24, %v218_v29 }
 0x262   :  { %1017 = vtanh.f32 %v222_v30 }
 0x268   :  { %v1018_v31 = vpop.eup %1017 }
 0x269   :  { %226 = vrot.lane.b32.xlu1 %v1018_v31, %s1081_s4 }
 0x2db   :  { %v227_v34 = vpop.permute.xlu1 %226 }
 0x2dc   :  { %v229_v36 = vmul.f32 %v227_v34, %v224_v32  ;;  %v1389_v32 = vld [vmem:[%s1567_s1 + $0x4] sm:$0x3] }
 0x2de   :  { %v234_v37 = vadd.f32 %v233_v35, %v229_v36 }
 0x2e0   :  { %v237_v38 = vsub.f32 %v234_v37, %v231_v33 }
 0x2e2   :  { %239 = vst [vmem:[#allocation1] ss:$4 sm:$0xff] %v237_v38 }
 0x2e9   :  { %v240_v40 = vld.sshfl [vmem:[#allocation1] sm:$0xff pattern:$0x73625140] }
 0x2ea   :  { %247 = vst [vmem:[#allocation1] ss:$4 sm:$0xff] %v234_v37  ;;  %241 = vrot.lane.b32.xlu2 %v240_v40, %s1081_s4 }
 0x2f1   :  { %v1383_v30 = vld.sshfl [vmem:[#allocation1] sm:$0xff pattern:$0x73625140] }
 0x344   :  { %v242_v42 = vpop.permute.xlu2 %241 }
 0x345   :  { %v244_v43 = vmul.f32 %v1349_v41, %v242_v42 }
 0x347   :  { %v1353_v44 = vadd.f32 %v244_v43, %v1313_v54 }
 0x349   :  { %338 = vrot.lane.b32.xlu1 %v1353_v44, %s1081_s4  ;;  %973 = vmatmul.msk.f32.vlgmr.msrb.gmra.mxu0 %vm47_vm0, %v1353_v44 }
 0x34a   :  { %974 = vmatmul.msk.f32.vlgmr.msrb.gmra.mxu1 %vm47_vm0, %v1353_v44  ;;  %706 = vmatpush.msrb.mxu0 %v1124_v0 }
 0x34b   :  { %726 = vmatpush.msrb.mxu1 %v1142_v3 }
 0x34c   :  { %707 = vmatpush.msrb.mxu0 %v1129_v1 }
 0x34d   :  { %727 = vmatpush.msrb.mxu1 %v1147_v4 }
 0x34e   :  { %708 = vmatpush.msrb.mxu0 %v1136_v2 }
 0x34f   :  { %728 = vmatpush.msrb.mxu1 %v1161_v6 }
 0x350   :  { %709 = vmatpush.msrb.mxu0 %v1153_v5 }
 0x351   :  { %729 = vmatpush.msrb.mxu1 %v1175_v8 }
 0x352   :  { %710 = vmatpush.msrb.mxu0 %v1167_v7 }
 0x353   :  { %730 = vmatpush.msrb.mxu1 %v1189_v10 }
 0x354   :  { %711 = vmatpush.msrb.mxu0 %v1181_v9 }
 0x355   :  { %731 = vmatpush.msrb.mxu1 %v1203_v12 }
 0x356   :  { %712 = vmatpush.msrb.mxu0 %v1195_v11 }
 0x357   :  { %732 = vmatpush.msrb.mxu1 %v1222_v15 }
 0x358   :  { %713 = vmatpush.msrb.mxu0 %v1209_v13 }
 0x359   :  { %733 = vmatpush.msrb.mxu1 %v1231_v16 }
 0x3bb   :  { %v339_v23 = vpop.permute.xlu1 %338 }
 0x3c6   :  { %v283_v46 = vpop.f32.mrf.mxu0 }
 0x3c7   :  { %v284_v47 = vadd.f32 %v283_v46, %v1293_v18  ;;  %v303_v59 = vpop.f32.mrf.mxu1 }
 0x3c8   :  { %v304_v63 = vadd.f32 %v303_v59, %v1299_v28  ;;  %v982_v59 = vld [vmem:[%s1566_s0 + $0x10] sm:$0xf] }
 0x3c9   :  { %v306_v48 = vadd.f32 %v972_v45, %v284_v47 }
 0x3cb   :  { %v975_v49 = vmul.f32 -1.442695, %v306_v48 }
 0x3cd   :  { %1019 = vpow2.f32 %v975_v49 }
 0x3d3   :  { %v1020_v50 = vpop.eup %1019 }
 0x3d4   :  { %v310_v52 = vadd.f32 1.0, %v1020_v50 }
 0x3d6   :  { %1021 = vrcp.f32 %v310_v52  ;;  %v322_v56 = vand.u32 2147483648, %v310_v52  ;;  %v320_v58 = vand.u32 2147483647, %v310_v52  ;;  %vm316_vm10 = vweird.f32 %v310_v52 }
 0x3d8   :  { %v323_v61 = vor.u32 1.1754944e-38, %v322_v56  ;;  %vm321_vm12 = vcmp.eq.f32.partialorder %v320_v58, 8.507059e+37 }
 0x3dc   :  { %v1022_v53 = vpop.eup %1021 }
 0x3dd   :  { %v312_v54 = vmul.f32 %v1022_v53, %v310_v52  ;;  %vm317_vm9 = vweird.f32 %v1022_v53 }
 0x3de   :  { %vm318_vm11 = vmor %vm316_vm10, %vm317_vm9 }
 0x3df   :  { %v313_v55 = vsub.f32 1.0, %v312_v54 }
 0x3e1   :  { %v314_v57 = vmul.f32 %v1022_v53, %v313_v55  ;;  %v1429_v55 = vld [vmem:[%s1567_s1 + $0x6] sm:$0x3] }
 0x3e3   :  { %v315_v60 = vadd.f32 %v1022_v53, %v314_v57 }
 0x3e5   :  { %v319_v14 = vsel %vm318_vm11, %v1022_v53, %v315_v60 }
 0x3e6   :  { %v324_v17 = vsel %vm321_vm12, %v323_v61, %v319_v14 }
 0x3e7   :  { %v326_v19 = vmul.f32 %v324_v17, %v304_v63  ;;  %v332_v22 = vsub.f32 1.0, %v324_v17  ;;  %v341_v25 = vmul.f32 %v339_v23, %v324_v17 }
 0x3e9   :  { %v330_v20 = vadd.f32 %v328_v62, %v326_v19 }
 0x3eb   :  { %1023 = vtanh.f32 %v330_v20 }
 0x3f1   :  { %v1024_v21 = vpop.eup %1023 }
 0x3f2   :  { %334 = vrot.lane.b32.xlu0 %v1024_v21, %s1081_s4 }
 0x464   :  { %v335_v24 = vpop.permute.xlu0 %334 }
 0x465   :  { %v337_v26 = vmul.f32 %v335_v24, %v332_v22 }
 0x467   :  { %v342_v27 = vadd.f32 %v341_v25, %v337_v26 }
 0x469   :  { %v345_v29 = vsub.f32 %v342_v27, %v339_v23 }
 0x46b   :  { %347 = vst [vmem:[#allocation1] ss:$4 sm:$0xff] %v345_v29  ;;  %v544_v29 = vrot.slane %v982_v59, 2 }
 0x472   :  { %v348_v31 = vld.sshfl [vmem:[#allocation1] sm:$0xff pattern:$0x73625140] }
 0x473   :  { %355 = vst [vmem:[#allocation1] ss:$4 sm:$0xff] %v342_v27  ;;  %349 = vrot.lane.b32.xlu2 %v348_v31, %s1081_s4 }
 0x47a   :  { %v1423_v53 = vld.sshfl [vmem:[#allocation1] sm:$0xff pattern:$0x73625140] }
 0x4cd   :  { %v350_v33 = vpop.permute.xlu2 %349 }
 0x4ce   :  { %v352_v34 = vmul.f32 %v1389_v32, %v350_v33 }
 0x4d0   :  { %v1393_v35 = vadd.f32 %v352_v34, %v1353_v44 }
 0x4d2   :  { %446 = vrot.lane.b32.xlu1 %v1393_v35, %s1081_s4  ;;  %978 = vmatmul.msk.f32.vlgmr.msrb.gmra.mxu2 %vm47_vm0, %v1393_v35 }
 0x4d3   :  { %979 = vmatmul.msk.f32.vlgmr.msrb.gmra.mxu3 %vm47_vm0, %v1393_v35  ;;  %814 = vmatpush.msrb.mxu2 %v1124_v0  ;;  %v977_v0 = vld [vmem:[%s1566_s0 + $0xc] sm:$0xf] }
 0x4d4   :  { %834 = vmatpush.msrb.mxu3 %v1142_v3  ;;  %v436_v36 = vrot.slane %v977_v0, 2 }
 0x4d5   :  { %815 = vmatpush.msrb.mxu2 %v1129_v1 }
 0x4d6   :  { %835 = vmatpush.msrb.mxu3 %v1147_v4 }
 0x4d7   :  { %816 = vmatpush.msrb.mxu2 %v1136_v2 }
 0x4d8   :  { %836 = vmatpush.msrb.mxu3 %v1161_v6 }
 0x4d9   :  { %817 = vmatpush.msrb.mxu2 %v1153_v5 }
 0x4da   :  { %837 = vmatpush.msrb.mxu3 %v1175_v8 }
 0x4db   :  { %818 = vmatpush.msrb.mxu2 %v1167_v7 }
 0x4dc   :  { %838 = vmatpush.msrb.mxu3 %v1189_v10 }
 0x4dd   :  { %819 = vmatpush.msrb.mxu2 %v1181_v9 }
 0x4de   :  { %839 = vmatpush.msrb.mxu3 %v1203_v12 }
 0x4df   :  { %820 = vmatpush.msrb.mxu2 %v1195_v11 }
 0x4e0   :  { %840 = vmatpush.msrb.mxu3 %v1222_v15 }
 0x4e1   :  { %821 = vmatpush.msrb.mxu2 %v1209_v13 }
 0x4e2   :  { %841 = vmatpush.msrb.mxu3 %v1231_v16 }
 0x544   :  { %v447_v46 = vpop.permute.xlu1 %446 }
 0x555   :  { %v391_v1 = vpop.f32.mrf.mxu2 }
 0x556   :  { %v392_v2 = vadd.f32 %v391_v1, %v1293_v18  ;;  %v411_v13 = vpop.f32.mrf.mxu3 }
 0x557   :  { %v412_v37 = vadd.f32 %v411_v13, %v1299_v28 }
 0x558   :  { %v414_v3 = vadd.f32 %v977_v0, %v392_v2 }
 0x55a   :  { %v980_v4 = vmul.f32 -1.442695, %v414_v3 }
 0x55c   :  { %1025 = vpow2.f32 %v980_v4 }
 0x562   :  { %v1026_v5 = vpop.eup %1025 }
 0x563   :  { %v418_v6 = vadd.f32 1.0, %v1026_v5 }
 0x565   :  { %1027 = vrcp.f32 %v418_v6  ;;  %v430_v10 = vand.u32 2147483648, %v418_v6  ;;  %v428_v12 = vand.u32 2147483647, %v418_v6  ;;  %vm424_vm14 = vweird.f32 %v418_v6 }
 0x567   :  { %v431_v16 = vor.u32 1.1754944e-38, %v430_v10  ;;  %vm429_vm1 = vcmp.eq.f32.partialorder %v428_v12, 8.507059e+37 }
 0x56b   :  { %v1028_v7 = vpop.eup %1027 }
 0x56c   :  { %v420_v8 = vmul.f32 %v1028_v7, %v418_v6  ;;  %vm425_vm13 = vweird.f32 %v1028_v7 }
 0x56d   :  { %vm426_vm15 = vmor %vm424_vm14, %vm425_vm13  ;;  %vm145_vm14 = vcmask 254976  }
 0x56e   :  { %v421_v9 = vsub.f32 1.0, %v420_v8 }
 0x570   :  { %v422_v11 = vmul.f32 %v1028_v7, %v421_v9 }
 0x572   :  { %v423_v15 = vadd.f32 %v1028_v7, %v422_v11  ;;  %v1448_v11 = vld [vmem:[%s1567_s1 + $0x8] sm:$0x3] }
 0x574   :  { %v427_v38 = vsel %vm426_vm15, %v1028_v7, %v423_v15 }
 0x575   :  { %v432_v40 = vsel %vm429_vm1, %v431_v16, %v427_v38  ;;  %v987_v16 = vld [vmem:[%s1566_s0 + $0x14] sm:$0xf] }
 0x576   :  { %v434_v42 = vmul.f32 %v432_v40, %v412_v37  ;;  %v440_v45 = vsub.f32 1.0, %v432_v40  ;;  %v449_v48 = vmul.f32 %v447_v46, %v432_v40 }
 0x578   :  { %v438_v43 = vadd.f32 %v436_v36, %v434_v42 }
 0x57a   :  { %1029 = vtanh.f32 %v438_v43 }
 0x580   :  { %v1030_v44 = vpop.eup %1029 }
 0x581   :  { %442 = vrot.lane.b32.xlu0 %v1030_v44, %s1081_s4 }
 0x5f3   :  { %v443_v47 = vpop.permute.xlu0 %442 }
 0x5f4   :  { %v445_v49 = vmul.f32 %v443_v47, %v440_v45 }
 0x5f6   :  { %v450_v50 = vadd.f32 %v449_v48, %v445_v49 }
 0x5f8   :  { %v453_v52 = vsub.f32 %v450_v50, %v447_v46 }
 0x5fa   :  { %455 = vst [vmem:[#allocation1] ss:$4 sm:$0xff] %v453_v52 }
 0x601   :  { %v456_v54 = vld.sshfl [vmem:[#allocation1] sm:$0xff pattern:$0x73625140] }
 0x602   :  { %457 = vrot.lane.b32.xlu2 %v456_v54, %s1081_s4  ;;  %463 = vst [vmem:[#allocation1] ss:$4 sm:$0xff] %v450_v50 }
 0x609   :  { %v1442_v9 = vld.sshfl [vmem:[#allocation1] sm:$0xff pattern:$0x73625140] }
 0x65c   :  { %v458_v56 = vpop.permute.xlu2 %457 }
 0x65d   :  { %v460_v57 = vmul.f32 %v1429_v55, %v458_v56  ;;  %v652_v56 = vrot.slane %v987_v16, 2 }
 0x65f   :  { %v461_v58 = vadd.f32 %v460_v57, %v1393_v35 }
 0x661   :  { %554 = vrot.lane.b32.xlu1 %v461_v58, %s1081_s4  ;;  %983 = vmatmul.msk.f32.vlgmr.msra.gmra.mxu0 %vm47_vm0, %v461_v58 }
 0x662   :  { %984 = vmatmul.msk.f32.vlgmr.msra.gmra.mxu1 %vm47_vm0, %v461_v58 }
 0x6d3   :  { %v555_v3 = vpop.permute.xlu1 %554 }
 0x6de   :  { %v499_v60 = vpop.f32.mrf.mxu0 }
 0x6df   :  { %v500_v61 = vadd.f32 %v499_v60, %v1293_v18  ;;  %v519_v25 = vpop.f32.mrf.mxu1 }
 0x6e0   :  { %v520_v31 = vadd.f32 %v519_v25, %v1299_v28  ;;  %v1466_v25 = vld [vmem:[%s1567_s1 + $0xa] sm:$0x3] }
 0x6e1   :  { %v522_v62 = vadd.f32 %v982_v59, %v500_v61 }
 0x6e3   :  { %v985_v63 = vmul.f32 -1.442695, %v522_v62 }
 0x6e5   :  { %1031 = vpow2.f32 %v985_v63 }
 0x6eb   :  { %v1032_v14 = vpop.eup %1031 }
 0x6ec   :  { %v526_v17 = vadd.f32 1.0, %v1032_v14 }
 0x6ee   :  { %1033 = vrcp.f32 %v526_v17  ;;  %v538_v22 = vand.u32 2147483648, %v526_v17  ;;  %v536_v24 = vand.u32 2147483647, %v526_v17  ;;  %vm532_vm3 = vweird.f32 %v526_v17 }
 0x6f0   :  { %v539_v27 = vor.u32 1.1754944e-38, %v538_v22  ;;  %vm537_vm5 = vcmp.eq.f32.partialorder %v536_v24, 8.507059e+37 }
 0x6f4   :  { %v1034_v19 = vpop.eup %1033 }
 0x6f5   :  { %v528_v20 = vmul.f32 %v1034_v19, %v526_v17  ;;  %vm533_vm2 = vweird.f32 %v1034_v19 }
 0x6f6   :  { %vm534_vm4 = vmor %vm532_vm3, %vm533_vm2  ;;  %vm940_vm3 = vcmask 517120  }
 0x6f7   :  { %v529_v21 = vsub.f32 1.0, %v528_v20 }
 0x6f9   :  { %v530_v23 = vmul.f32 %v1034_v19, %v529_v21 }
 0x6fb   :  { %v531_v26 = vadd.f32 %v1034_v19, %v530_v23 }
 0x6fd   :  { %v535_v33 = vsel %vm534_vm4, %v1034_v19, %v531_v26 }
 0x6fe   :  { %v540_v34 = vsel %vm537_vm5, %v539_v27, %v535_v33 }
 0x6ff   :  { %v542_v35 = vmul.f32 %v540_v34, %v520_v31  ;;  %v548_v2 = vsub.f32 1.0, %v540_v34  ;;  %v557_v5 = vmul.f32 %v555_v3, %v540_v34  ;;  %v992_v31 = vld [vmem:[%s1566_s0 + $0x18] sm:$0xf] }
 0x701   :  { %v546_v0 = vadd.f32 %v544_v29, %v542_v35 }
 0x703   :  { %1035 = vtanh.f32 %v546_v0 }
 0x709   :  { %v1036_v1 = vpop.eup %1035 }
 0x70a   :  { %550 = vrot.lane.b32.xlu0 %v1036_v1, %s1081_s4 }
 0x77c   :  { %v551_v4 = vpop.permute.xlu0 %550 }
 0x77d   :  { %v553_v6 = vmul.f32 %v551_v4, %v548_v2 }
 0x77f   :  { %v558_v7 = vadd.f32 %v557_v5, %v553_v6 }
 0x781   :  { %v561_v8 = vsub.f32 %v558_v7, %v555_v3 }
 0x783   :  { %563 = vst [vmem:[#allocation1] ss:$4 sm:$0xff] %v561_v8 }
 0x78a   :  { %v564_v10 = vld.sshfl [vmem:[#allocation1] sm:$0xff pattern:$0x73625140] }
 0x78b   :  { %565 = vrot.lane.b32.xlu2 %v564_v10, %s1081_s4  ;;  %571 = vst [vmem:[#allocation1] ss:$4 sm:$0xff] %v558_v7 }
 0x792   :  { %v1460_v23 = vld.sshfl [vmem:[#allocation1] sm:$0xff pattern:$0x73625140] }
 0x7e5   :  { %v566_v12 = vpop.permute.xlu2 %565 }
 0x7e6   :  { %v568_v13 = vmul.f32 %v1448_v11, %v566_v12 }
 0x7e8   :  { %v569_v15 = vadd.f32 %v568_v13, %v461_v58 }
 0x7ea   :  { %662 = vrot.lane.b32.xlu1 %v569_v15, %s1081_s4  ;;  %988 = vmatmul.msk.f32.vlgmr.msra.gmra.mxu2 %vm47_vm0, %v569_v15 }
 0x7eb   :  { %989 = vmatmul.msk.f32.vlgmr.msra.gmra.mxu3 %vm47_vm0, %v569_v15 }
 0x85c   :  { %v663_v14 = vpop.permute.xlu1 %662 }
 0x86d   :  { %v607_v36 = vpop.f32.mrf.mxu2 }
 0x86e   :  { %v608_v37 = vadd.f32 %v607_v36, %v1293_v18  ;;  %v627_v50 = vpop.f32.mrf.mxu3 }
 0x86f   :  { %v628_v57 = vadd.f32 %v627_v50, %v1299_v28 }
 0x870   :  { %v630_v38 = vadd.f32 %v987_v16, %v608_v37 }
 0x872   :  { %v990_v40 = vmul.f32 -1.442695, %v630_v38 }
 0x874   :  { %1037 = vpow2.f32 %v990_v40 }
 0x87a   :  { %v1038_v42 = vpop.eup %1037 }
 0x87b   :  { %v634_v43 = vadd.f32 1.0, %v1038_v42 }
 0x87d   :  { %1039 = vrcp.f32 %v634_v43  ;;  %v646_v47 = vand.u32 2147483648, %v634_v43  ;;  %v644_v49 = vand.u32 2147483647, %v634_v43  ;;  %vm640_vm7 = vweird.f32 %v634_v43 }
 0x87f   :  { %v647_v54 = vor.u32 1.1754944e-38, %v646_v47  ;;  %vm645_vm9 = vcmp.eq.f32.partialorder %v644_v49, 8.507059e+37 }
 0x883   :  { %v1040_v44 = vpop.eup %1039 }
 0x884   :  { %v636_v45 = vmul.f32 %v1040_v44, %v634_v43  ;;  %vm641_vm6 = vweird.f32 %v1040_v44 }
 0x885   :  { %vm642_vm8 = vmor %vm640_vm7, %vm641_vm6 }
 0x886   :  { %v637_v46 = vsub.f32 1.0, %v636_v45 }
 0x888   :  { %v638_v48 = vmul.f32 %v1040_v44, %v637_v46 }
 0x88a   :  { %v639_v52 = vadd.f32 %v1040_v44, %v638_v48 }
 0x88c   :  { %v643_v58 = vsel %vm642_vm8, %v1040_v44, %v639_v52 }
 0x88d   :  { %v648_v59 = vsel %vm645_vm9, %v647_v54, %v643_v58 }
 0x88e   :  { %v650_v60 = vmul.f32 %v648_v59, %v628_v57  ;;  %v656_v63 = vsub.f32 1.0, %v648_v59  ;;  %v665_v19 = vmul.f32 %v663_v14, %v648_v59 }
 0x890   :  { %v654_v61 = vadd.f32 %v652_v56, %v650_v60  ;;  %v996_v56 = vld [vmem:[%s1567_s1 + $0xc] sm:$0x3] }
 0x892   :  { %1041 = vtanh.f32 %v654_v61 }
 0x898   :  { %v1042_v62 = vpop.eup %1041 }
 0x899   :  { %658 = vrot.lane.b32.xlu0 %v1042_v62, %s1081_s4 }
 0x90b   :  { %v659_v17 = vpop.permute.xlu0 %658 }
 0x90c   :  { %v661_v20 = vmul.f32 %v659_v17, %v656_v63 }
 0x90e   :  { %v666_v21 = vadd.f32 %v665_v19, %v661_v20  ;;  %v997_v19 = vld [vmem:[%s1566_s0 + $0x1c] sm:$0xf] }
 0x910   :  { %v669_v22 = vsub.f32 %v666_v21, %v663_v14 }
 0x912   :  { %671 = vst [vmem:[#allocation1] ss:$4 sm:$0xff] %v669_v22 }
 0x919   :  { %v672_v24 = vld.sshfl [vmem:[#allocation1] sm:$0xff pattern:$0x73625140] }
 0x91a   :  { %673 = vrot.lane.b32.xlu2 %v672_v24, %s1081_s4  ;;  %679 = vst [vmem:[#allocation1] ss:$4 sm:$0xff] %v666_v21 }
 0x921   :  { %v680_v50 = vld.sshfl [vmem:[#allocation1] sm:$0xff pattern:$0x73625140] }
 0x974   :  { %v674_v26 = vpop.permute.xlu2 %673 }
 0x975   :  { %v676_v27 = vmul.f32 %v1466_v25, %v674_v26 }
 0x977   :  { %v677_v29 = vadd.f32 %v676_v27, %v569_v15  ;;  %v760_v15 = vrot.slane %v992_v31, 2 }
 0x979   :  { %770 = vrot.lane.b32.xlu1 %v677_v29, %s1081_s4  ;;  %993 = vmatmul.msk.f32.vlgmr.msrb.gmra.mxu0 %vm47_vm0, %v677_v29 }
 0x97a   :  { %994 = vmatmul.msk.f32.vlgmr.msrb.gmra.mxu1 %vm47_vm0, %v677_v29 }
 0x9eb   :  { %v771_v44 = vpop.permute.xlu1 %770 }
 0x9f6   :  { %v715_v33 = vpop.f32.mrf.mxu0 }
 0x9f7   :  { %v716_v34 = vadd.f32 %v715_v33, %v1293_v18  ;;  %v735_v10 = vpop.f32.mrf.mxu1 }
 0x9f8   :  { %v736_v16 = vadd.f32 %v735_v10, %v1299_v28 }
 0x9f9   :  { %v738_v35 = vadd.f32 %v992_v31, %v716_v34 }
 0x9fb   :  { %v995_v0 = vmul.f32 -1.442695, %v738_v35 }
 0x9fd   :  { %1043 = vpow2.f32 %v995_v0 }
 0xa03   :  { %v1044_v1 = vpop.eup %1043 }
 0xa04   :  { %v742_v2 = vadd.f32 1.0, %v1044_v1 }
 0xa06   :  { %1045 = vrcp.f32 %v742_v2  ;;  %v754_v6 = vand.u32 2147483648, %v742_v2  ;;  %v752_v8 = vand.u32 2147483647, %v742_v2  ;;  %vm748_vm11 = vweird.f32 %v742_v2 }
 0xa08   :  { %v755_v13 = vor.u32 1.1754944e-38, %v754_v6  ;;  %vm753_vm13 = vcmp.eq.f32.partialorder %v752_v8, 8.507059e+37 }
 0xa0c   :  { %v1046_v3 = vpop.eup %1045 }
 0xa0d   :  { %v744_v4 = vmul.f32 %v1046_v3, %v742_v2  ;;  %vm749_vm10 = vweird.f32 %v1046_v3 }
 0xa0e   :  { %vm750_vm12 = vmor %vm748_vm11, %vm749_vm10 }
 0xa0f   :  { %v745_v5 = vsub.f32 1.0, %v744_v4  ;;  %v868_v4 = vrot.slane %v997_v19, 2 }
 0xa11   :  { %v746_v7 = vmul.f32 %v1046_v3, %v745_v5 }
 0xa13   :  { %v747_v12 = vadd.f32 %v1046_v3, %v746_v7 }
 0xa15   :  { %v751_v36 = vsel %vm750_vm12, %v1046_v3, %v747_v12 }
 0xa16   :  { %v756_v37 = vsel %vm753_vm13, %v755_v13, %v751_v36 }
 0xa17   :  { %v758_v38 = vmul.f32 %v756_v37, %v736_v16  ;;  %v764_v43 = vsub.f32 1.0, %v756_v37  ;;  %v773_v46 = vmul.f32 %v771_v44, %v756_v37 }
 0xa19   :  { %v762_v40 = vadd.f32 %v760_v15, %v758_v38 }
 0xa1b   :  { %1047 = vtanh.f32 %v762_v40 }
 0xa21   :  { %v1048_v42 = vpop.eup %1047 }
 0xa22   :  { %766 = vrot.lane.b32.xlu0 %v1048_v42, %s1081_s4 }
 0xa94   :  { %v767_v45 = vpop.permute.xlu0 %766 }
 0xa95   :  { %v769_v47 = vmul.f32 %v767_v45, %v764_v43 }
 0xa97   :  { %v774_v48 = vadd.f32 %v773_v46, %v769_v47 }
 0xa99   :  { %v777_v49 = vsub.f32 %v774_v48, %v771_v44 }
 0xa9b   :  { %779 = vst [vmem:[#allocation1] ss:$4 sm:$0xff] %v777_v49 }
 0xaa2   :  { %v780_v52 = vld.sshfl [vmem:[#allocation1] sm:$0xff pattern:$0x73625140] }
 0xaa3   :  { %781 = vrot.lane.b32.xlu2 %v780_v52, %s1081_s4  ;;  %787 = vst [vmem:[#allocation1] ss:$4 sm:$0xff] %v774_v48 }
 0xaaa   :  { %v788_v54 = vld.sshfl [vmem:[#allocation1] sm:$0xff pattern:$0x73625140] }
 0xaab   :  { %141 = vrot.lane.b32.xlu2 %v1343_v39, %s1081_s4 }
 0xab3   :  { %465 = vrot.lane.b32.xlu2 %v1442_v9, %s1081_s4 }
 0xabb   :  { %789 = vrot.lane.b32.xlu2 %v788_v54, %s1081_s4 }
 0xafd   :  { %v782_v57 = vpop.permute.xlu2 %781 }
 0xafe   :  { %v784_v58 = vmul.f32 %v996_v56, %v782_v57 }
 0xb00   :  { %v1487_v59 = vadd.f32 %v784_v58, %v677_v29 }
 0xb02   :  { %878 = vrot.lane.b32.xlu1 %v1487_v59, %s1081_s4  ;;  %998 = vmatmul.msk.f32.vlgmr.msrb.gmra.mxu2 %vm47_vm0, %v1487_v59 }
 0xb03   :  { %999 = vmatmul.msk.f32.vlgmr.msrb.gmra.mxu3 %vm47_vm0, %v1487_v59 }
 0xb05   :  { %v142_v39 = vpop.permute.xlu2 %141 }
 0xb06   :  { %v144_v9 = vmul.f32 %v142_v39, %v1309_v51  ;;  %v1001_v39 = vld [vmem:[%s1567_s1 + $0xe] sm:$0x3] }
 0xb08   :  { %146 = vst.msk [vmem:[#allocation2] sm:$0x3] %vm145_vm14, %v144_v9 }
 0xb0a   :  { %357 = vrot.lane.b32.xlu1 %v1423_v53, %s1081_s4 }
 0xb0d   :  { %v466_v60 = vpop.permute.xlu2 %465 }
 0xb0e   :  { %v468_v61 = vmul.f32 %v1429_v55, %v466_v60 }
 0xb10   :  { %470 = vst.msk [vmem:[#allocation2 + $0x6] sm:$0x3] %vm145_vm14, %v468_v61 }
 0xb12   :  { %681 = vrot.lane.b32.xlu1 %v680_v50, %s1081_s4 }
 0xb15   :  { %v790_v62 = vpop.permute.xlu2 %789 }
 0xb16   :  { %v792_v63 = vmul.f32 %v996_v56, %v790_v62 }
 0xb17   :  { %v911_v56 = vld [vmem:[#allocation2 + $0x6] sm:$0x3] }
 0xb18   :  { %794 = vst.msk [vmem:[#allocation2 + $0xc] sm:$0x3] %vm145_vm14, %v792_v63 }
 0xb1a   :  { %148 = vrot.lane.b32.xlu1 %v144_v9, %s1082_s9 }
 0xb1f   :  { %v914_v49 = vld [vmem:[#allocation2 + $0xc] sm:$0x3] }
 0xb22   :  { %472 = vrot.lane.b32.xlu1 %v468_v61, %s1082_s9 }
 0xb2a   :  { %796 = vrot.lane.b32.xlu1 %v792_v63, %s1082_s9 }
 0xb74   :  { %v879_v51 = vpop.permute.xlu1 %878 }
 0xb7c   :  { %v358_v53 = vpop.permute.xlu1 %357 }
 0xb7d   :  { %v1507_v14 = vmul.f32 %v1389_v32, %v358_v53 }
 0xb7f   :  { %362 = vst.msk [vmem:[#allocation2 + $0x4] sm:$0x3] %vm145_vm14, %v1507_v14 }
 0xb84   :  { %v682_v55 = vpop.permute.xlu1 %681 }
 0xb85   :  { %v1512_v17 = vmul.f32 %v1466_v25, %v682_v55  ;;  %v823_v20 = vpop.f32.mrf.mxu2 }
 0xb86   :  { %v824_v21 = vadd.f32 %v823_v20, %v1293_v18  ;;  %v843_v1 = vpop.f32.mrf.mxu3 }
 0xb87   :  { %686 = vst.msk [vmem:[#allocation2 + $0xa] sm:$0x3] %vm145_vm14, %v1512_v17  ;;  %v844_v5 = vadd.f32 %v843_v1, %v1299_v28 }
 0xb88   :  { %v846_v22 = vadd.f32 %v997_v19, %v824_v21  ;;  %v910_v19 = vld [vmem:[#allocation2 + $0x4] sm:$0x3] }
 0xb8a   :  { %v1000_v32 = vmul.f32 -1.442695, %v846_v22 }
 0xb8c   :  { %1049 = vpow2.f32 %v1000_v32  ;;  %v149_v24 = vpop.permute.xlu1 %148 }
 0xb8d   :  { %152 = vst.msk [vmem:[#allocation3 + $0xe] sm:$0x3] %vm145_vm14, %v149_v24 }
 0xb8e   :  { %v913_v53 = vld [vmem:[#allocation2 + $0xa] sm:$0x3] }
 0xb92   :  { %v1050_v26 = vpop.eup %1049 }
 0xb93   :  { %v850_v27 = vadd.f32 1.0, %v1050_v26 }
 0xb94   :  { %v473_v25 = vpop.permute.xlu1 %472  ;;  %v923_v62 = vld [vmem:[#allocation3 + $0xe] sm:$0x3] }
 0xb95   :  { %1051 = vrcp.f32 %v850_v27  ;;  %476 = vst.msk [vmem:[#allocation3 + $0x8] sm:$0x3] %vm145_vm14, %v473_v25  ;;  %v862_v34 = vand.u32 2147483648, %v850_v27  ;;  %v860_v0 = vand.u32 2147483647, %v850_v27  ;;  %vm856_vm15 = vweird.f32 %v850_v27 }
 0xb97   :  { %v863_v3 = vor.u32 1.1754944e-38, %v862_v34  ;;  %vm861_vm2 = vcmp.eq.f32.partialorder %v860_v0, 8.507059e+37 }
 0xb9b   :  { %v1052_v29 = vpop.eup %1051 }
 0xb9c   :  { %v852_v31 = vmul.f32 %v1052_v29, %v850_v27  ;;  %v797_v33 = vpop.permute.xlu1 %796  ;;  %vm857_vm0 = vweird.f32 %v1052_v29  ;;  %v908_v27 = vld [vmem:[#allocation2] sm:$0x3] }
 0xb9d   :  { %800 = vst.msk [vmem:[#allocation3 + $0x2] sm:$0x3] %vm145_vm14, %v797_v33  ;;  %vm858_vm1 = vmor %vm856_vm15, %vm857_vm0 }
 0xb9e   :  { %v853_v18 = vsub.f32 1.0, %v852_v31 }
 0xba0   :  { %v854_v35 = vmul.f32 %v1052_v29, %v853_v18 }
 0xba2   :  { %v855_v2 = vadd.f32 %v1052_v29, %v854_v35 }
 0xba4   :  { %v859_v6 = vsel %vm858_vm1, %v1052_v29, %v855_v2 }
 0xba5   :  { %v864_v7 = vsel %vm861_vm2, %v863_v3, %v859_v6 }
 0xba6   :  { %v866_v8 = vmul.f32 %v864_v7, %v844_v5  ;;  %v872_v13 = vsub.f32 1.0, %v864_v7  ;;  %v881_v16 = vmul.f32 %v879_v51, %v864_v7 }
 0xba8   :  { %v870_v10 = vadd.f32 %v868_v4, %v866_v8 }
 0xbaa   :  { %1053 = vtanh.f32 %v870_v10 }
 0xbb0   :  { %v1054_v12 = vpop.eup %1053 }
 0xbb1   :  { %874 = vrot.lane.b32.xlu0 %v1054_v12, %s1081_s4 }
 0xbb9   :  { %249 = vrot.lane.b32.xlu0 %v1383_v30, %s1081_s4 }
 0xbc1   :  { %573 = vrot.lane.b32.xlu0 %v1460_v23, %s1081_s4  ;;  %v917_v23 = vld [vmem:[#allocation3 + $0x2] sm:$0x3] }
 0xc23   :  { %v875_v15 = vpop.permute.xlu0 %874 }
 0xc24   :  { %v877_v36 = vmul.f32 %v875_v15, %v872_v13 }
 0xc26   :  { %v882_v28 = vadd.f32 %v881_v16, %v877_v36 }
 0xc28   :  { %v885_v37 = vsub.f32 %v882_v28, %v879_v51 }
 0xc2a   :  { %887 = vst [vmem:[#allocation1] ss:$4 sm:$0xff] %v885_v37 }
 0xc2b   :  { %v250_v38 = vpop.permute.xlu0 %249 }
 0xc2c   :  { %v252_v40 = vmul.f32 %v1349_v41, %v250_v38  ;;  %v920_v41 = vld [vmem:[#allocation3 + $0x8] sm:$0x3] }
 0xc2e   :  { %254 = vst.msk [vmem:[#allocation2 + $0x2] sm:$0x3] %vm145_vm14, %v252_v40  ;;  %256 = vrot.lane.b32.xlu2 %v252_v40, %s1082_s9 }
 0xc31   :  { %v888_v42 = vld.sshfl [vmem:[#allocation1] sm:$0xff pattern:$0x73625140] }
 0xc32   :  { %895 = vst [vmem:[#allocation1] ss:$4 sm:$0xff] %v882_v28 }
 0xc33   :  { %v574_v30 = vpop.permute.xlu0 %573 }
 0xc34   :  { %v576_v43 = vmul.f32 %v1448_v11, %v574_v30 }
 0xc35   :  { %v909_v44 = vld [vmem:[#allocation2 + $0x2] sm:$0x3] }
 0xc36   :  { %v925_v45 = vadd.f32 %v917_v23, %v909_v44  ;;  %578 = vst.msk [vmem:[#allocation2 + $0x8] sm:$0x3] %vm145_vm14, %v576_v43  ;;  %580 = vrot.lane.b32.xlu2 %v576_v43, %s1082_s9 }
 0xc38   :  { %933 = vst.msk [vmem:[#allocation4 + $0x2] sm:$0x3] %vm145_vm14, %v925_v45 }
 0xc39   :  { %v896_v46 = vld.sshfl [vmem:[#allocation1] sm:$0xff pattern:$0x73625140] }
 0xc3a   :  { %897 = vrot.lane.b32.xlu0 %v896_v46, %s1081_s4 }
 0xc3d   :  { %v912_v47 = vld [vmem:[#allocation2 + $0x8] sm:$0x3] }
 0xc3e   :  { %v928_v48 = vadd.f32 %v920_v41, %v912_v47 }
 0xc40   :  { %936 = vst.msk [vmem:[#allocation4 + $0x8] sm:$0x3] %vm145_vm14, %v928_v48 }
 0xc42   :  { %364 = vrot.lane.b32.xlu0 %v1507_v14, %s1082_s9 }
 0xc4a   :  { %688 = vrot.lane.b32.xlu0 %v1512_v17, %s1082_s9 }
 0xc52   :  { %889 = vrot.lane.b32.xlu0 %v888_v42, %s1081_s4 }
 0xc88   :  { %v257_v11 = vpop.permute.xlu2 %256 }
 0xc89   :  { %260 = vst.msk [vmem:[#allocation3 + $0xc] sm:$0x3] %vm145_vm14, %v257_v11 }
 0xc90   :  { %v922_v50 = vld [vmem:[#allocation3 + $0xc] sm:$0x3]  ;;  %v581_v52 = vpop.permute.xlu2 %580 }
 0xc91   :  { %v930_v54 = vadd.f32 %v922_v50, %v914_v49  ;;  %584 = vst.msk [vmem:[#allocation3 + $0x6] sm:$0x3] %vm145_vm14, %v581_v52 }
 0xc93   :  { %938 = vst.msk [vmem:[#allocation4 + $0xc] sm:$0x3] %vm145_vm14, %v930_v54 }
 0xc98   :  { %v919_v57 = vld [vmem:[#allocation3 + $0x6] sm:$0x3] }
 0xc99   :  { %v927_v58 = vadd.f32 %v919_v57, %v911_v56 }
 0xc9b   :  { %935 = vst.msk [vmem:[#allocation4 + $0x6] sm:$0x3] %vm145_vm14, %v927_v58 }
 0xcac   :  { %v898_v9 = vpop.permute.xlu0 %897 }
 0xcad   :  { %v900_v60 = vmul.f32 %v1001_v39, %v898_v9 }
 0xcaf   :  { %902 = vst.msk [vmem:[#allocation2 + $0xe] sm:$0x3] %vm145_vm14, %v900_v60  ;;  %904 = vrot.lane.b32.xlu2 %v900_v60, %s1082_s9 }
 0xcb4   :  { %v365_v61 = vpop.permute.xlu0 %364 }
 0xcb5   :  { %368 = vst.msk [vmem:[#allocation3 + $0xa] sm:$0x3] %vm145_vm14, %v365_v61 }
 0xcb6   :  { %v915_v63 = vld [vmem:[#allocation2 + $0xe] sm:$0x3] }
 0xcb7   :  { %v931_v51 = vadd.f32 %v923_v62, %v915_v63 }
 0xcb9   :  { %939 = vst.msk [vmem:[#allocation4 + $0xe] sm:$0x3] %vm145_vm14, %v931_v51 }
 0xcbc   :  { %v921_v14 = vld [vmem:[#allocation3 + $0xa] sm:$0x3]  ;;  %v689_v55 = vpop.permute.xlu0 %688 }
 0xcbd   :  { %v929_v17 = vadd.f32 %v921_v14, %v913_v53  ;;  %692 = vst.msk [vmem:[#allocation3 + $0x4] sm:$0x3] %vm145_vm14, %v689_v55 }
 0xcbf   :  { %937 = vst.msk [vmem:[#allocation4 + $0xa] sm:$0x3] %vm145_vm14, %v929_v17 }
 0xcc4   :  { %v918_v20 = vld [vmem:[#allocation3 + $0x4] sm:$0x3]  ;;  %v890_v21 = vpop.permute.xlu0 %889 }
 0xcc5   :  { %v926_v22 = vadd.f32 %v918_v20, %v910_v19  ;;  %v892_v32 = vmul.f32 %v1001_v39, %v890_v21 }
 0xcc7   :  { %934 = vst.msk [vmem:[#allocation4 + $0x4] sm:$0x3] %vm145_vm14, %v926_v22  ;;  %v893_v24 = vadd.f32 %v892_v32, %v1487_v59 }
 0xcc9   :  { %941 = vst.msk [vmem:[%s1572_s6] sm:$0x3] %vm940_vm3, %v893_v24 }
 0xd09   :  { %v905_v26 = vpop.permute.xlu2 %904 }
 0xd0a   :  { %907 = vst.msk [vmem:[#allocation3] sm:$0x3] %vm145_vm14, %v905_v26 }
 0xd11   :  { %v916_v25 = vld [vmem:[#allocation3] sm:$0x3] }
 0xd12   :  { %v924_v29 = vadd.f32 %v916_v25, %v908_v27 }
 0xd14   :  { %932 = vst.msk [vmem:[#allocation4] sm:$0x3] %vm145_vm14, %v924_v29 }
 0xd15   :  { %954 = dma.vmem_to_hbm [thread:$0]  %s947_s14, 256, %s949_s17, [#allocation5], %s1084_s18, %s1084_s18, %s1085_s19  }
 0xd16   :  { %1079 = dma.done.wait [#allocation5], 256  }
 0xd17   :  { %1080 = vsyncadd [#allocation5], 4294967040 }
 0xd18   :  { %963 = vsyncpa [#allocation5], 1 }

</bundles_post_ra>
